<compile_context>
chip_gen: v7x
topology: tpu7x:2x2x1
jax: 0.10.0
libtpu: 0.0.40
codegen_flags: <defaults>
</compile_context>

<pallas_src>
import math
import jax
import jax.numpy as jnp
from jax.experimental import pallas as pl
from jax.experimental.pallas import tpu as pltpu


def _softplus(z):
    # Numerically stable softplus, identical formula used in kernel and reference.
    return jnp.maximum(z, 0.0) + jnp.log(1.0 + jnp.exp(-jnp.abs(z)))


def _ssm_kernel(x_ref,                       # (L, d_in)       per-batch block
                wdl_ref, bdl_ref,            # (d_in, dt_rank), (1, dt_rank)
                wb_ref, bb_ref,              # (d_in, Ns), (1, Ns)
                wc_ref, bc_ref,              # (d_in, Ns), (1, Ns)
                wdt_ref, bdt_ref,            # (dt_rank, d_in), (1, d_in)
                alog_ref, dvec_ref,          # (d_in, Ns), (1, d_in)
                o_ref,                       # (L, d_in)
                da_sc, hs_sc):               # VMEM scratch (L, d_in, Ns) x2
    x = x_ref[...]                           # (L, d_in) f32
    L = x.shape[0]
    d_in = x.shape[1]
    n_state = alog_ref.shape[1]

    # ---- Input projections: lane-dense MXU matmuls over the whole sequence ----
    delta_lr = jnp.dot(x, wdl_ref[...], preferred_element_type=jnp.float32) + bdl_ref[...]
    Bm = jnp.dot(x, wb_ref[...], preferred_element_type=jnp.float32) + bb_ref[...]   # (L, Ns)
    Cm = jnp.dot(x, wc_ref[...], preferred_element_type=jnp.float32) + bc_ref[...]   # (L, Ns)

    z = jnp.dot(delta_lr, wdt_ref[...], preferred_element_type=jnp.float32) + bdt_ref[...]
    delta = _softplus(z)                                                              # (L, d_in)

    A = -jnp.exp(alog_ref[...])                                                       # (d_in, Ns)

    # ---- Vectorized precompute: all EUP/VPU work hoisted out of the scan ----
    da_sc[...] = jnp.exp(delta[:, :, None] * A[None, :, :])                           # deltaA (L, d_in, Ns)
    hs_sc[...] = (delta * x)[:, :, None] * Bm[:, None, :]                             # BX, overwritten by h_t

    # ---- Sequential recurrence over time: h_t = dA_t * h_{t-1} + BX_t ----
    def step(t, h):
        h = da_sc[t] * h + hs_sc[t]
        hs_sc[t] = h
        return h

    jax.lax.fori_loop(0, L, step,
                      jnp.zeros((d_in, n_state), jnp.float32),
                      unroll=True)

    # ---- y = (hs . C) + D * x ; single lane-dense block store ----
    y = jnp.sum(hs_sc[...] * Cm[:, None, :], axis=-1) + dvec_ref[...] * x
    o_ref[...] = y.astype(o_ref.dtype)


def ssm_forward(x, params):
    """x: (batch, L, in_features) f32. Returns (batch, L, dim_inner)."""
    w_dbc, b_dbc, w_dt, b_dt, a_log, d_vec = params
    batch, L, d_in = x.shape
    dt_rank = w_dt.shape[0]
    dim_inner = w_dt.shape[1]
    n_state = a_log.shape[1]
    assert d_in == dim_inner, "SSM requires in_features == dim_inner"

    # Split the fused deltaBC projection in the wrapper so the kernel only does
    # tile-aligned matmuls (no odd-offset lane slicing of activations).
    w_dl = w_dbc[:, :dt_rank]
    w_b = w_dbc[:, dt_rank:dt_rank + n_state]
    w_c = w_dbc[:, dt_rank + n_state:dt_rank + 2 * n_state]
    b_dl = b_dbc[:dt_rank].reshape(1, dt_rank)
    b_b = b_dbc[dt_rank:dt_rank + n_state].reshape(1, n_state)
    b_c = b_dbc[dt_rank + n_state:dt_rank + 2 * n_state].reshape(1, n_state)
    b_dt2 = b_dt.reshape(1, dim_inner)
    d_2d = d_vec.reshape(1, dim_inner)

    full = lambda shape: pl.BlockSpec(shape, lambda b: (0, 0))

    # Advisory cost estimate (transcendental-dominated kernel).
    flops = batch * L * (2 * d_in * (dt_rank + 2 * n_state)
                         + 2 * dt_rank * dim_inner
                         + 8 * dim_inner * n_state)
    transcendentals = batch * L * dim_inner * (n_state + 2)
    bytes_accessed = 4 * (2 * batch * L * d_in
                          + int(w_dbc.size) + int(b_dbc.size)
                          + int(w_dt.size) + int(b_dt.size)
                          + int(a_log.size) + int(d_vec.size))

    out = pl.pallas_call(
        _ssm_kernel,
        out_shape=jax.ShapeDtypeStruct((batch, L, dim_inner), x.dtype),
        grid=(batch,),
        in_specs=[
            pl.BlockSpec((None, L, d_in), lambda b: (b, 0, 0)),   # x, one batch / step
            full((d_in, dt_rank)), full((1, dt_rank)),            # W_delta, b_delta
            full((d_in, n_state)), full((1, n_state)),            # W_B, b_B
            full((d_in, n_state)), full((1, n_state)),            # W_C, b_C
            full((dt_rank, dim_inner)), full((1, dim_inner)),     # W_dt, b_dt
            full((dim_inner, n_state)),                           # A_log
            full((1, dim_inner)),                                 # D
        ],
        out_specs=pl.BlockSpec((None, L, dim_inner), lambda b: (b, 0, 0)),
        scratch_shapes=[
            pltpu.VMEM((L, dim_inner, n_state), jnp.float32),     # deltaA
            pltpu.VMEM((L, dim_inner, n_state), jnp.float32),     # BX -> hs (in place)
        ],
        compiler_params=pltpu.CompilerParams(
            dimension_semantics=("parallel",)),
        cost_estimate=pl.CostEstimate(
            flops=flops, transcendentals=transcendentals,
            bytes_accessed=bytes_accessed),
    )(x, w_dl, b_dl, w_b, b_b, w_c, b_c, w_dt, b_dt2, a_log, d_2d)

    return out


def init_params(key, in_features, dt_rank, dim_inner, d_state):
    """Matches the PyTorch SSM module init (nn.Linear default uniform, A_log, D=1)."""
    ks = jax.random.split(key, 4)

    def linear(kw, kb, fan_in, fan_out):
        bound = 1.0 / math.sqrt(fan_in)
        w = jax.random.uniform(kw, (fan_in, fan_out), jnp.float32, -bound, bound)
        b = jax.random.uniform(kb, (fan_out,), jnp.float32, -bound, bound)
        return w, b

    w_dbc, b_dbc = linear(ks[0], ks[1], in_features, dt_rank + 2 * d_state)
    w_dt, b_dt = linear(ks[2], ks[3], dt_rank, dim_inner)
    a_log = jnp.log(jnp.tile(jnp.arange(1, d_state + 1, dtype=jnp.float32),
                             (dim_inner, 1)))                      # (dim_inner, d_state)
    d_vec = jnp.ones((dim_inner,), jnp.float32)
    return (w_dbc, b_dbc, w_dt, b_dt, a_log, d_vec)


def ssm_ref(x, params):
    """Pure-JAX reference: mirrors SSM.forward -> selective_scan_seq."""
    w_dbc, b_dbc, w_dt, b_dt, a_log, d_vec = params
    dt_rank = w_dt.shape[0]
    d_state = a_log.shape[1]

    A = -jnp.exp(a_log)
    dbc = x @ w_dbc + b_dbc
    delta_lr = dbc[..., :dt_rank]
    Bm = dbc[..., dt_rank:dt_rank + d_state]
    Cm = dbc[..., dt_rank + d_state:dt_rank + 2 * d_state]
    delta = _softplus(delta_lr @ w_dt + b_dt)                       # (B, L, d_in)

    dA = jnp.exp(delta[..., None] * A)                              # (B, L, d_in, Ns)
    bx = delta[..., None] * Bm[..., None, :] * x[..., None]         # (B, L, d_in, Ns)

    def scan_one(dA_b, bx_b):
        def step(h, inp):
            da_t, bx_t = inp
            h = da_t * h + bx_t
            return h, h
        h0 = jnp.zeros(dA_b.shape[1:], jnp.float32)
        _, hs = jax.lax.scan(step, h0, (dA_b, bx_b))
        return hs

    hs = jax.vmap(scan_one)(dA, bx)                                 # (B, L, d_in, Ns)
    y = jnp.sum(hs * Cm[..., None, :], axis=-1) + d_vec * x
    return y


if __name__ == "__main__":
    key = jax.random.PRNGKey(0)
    k_x, k_p = jax.random.split(key)

    batch, seq = 2, 8
    in_features = dim_inner = 32
    dt_rank = 8
    d_state = 16

    x = jax.random.normal(k_x, (batch, seq, in_features), jnp.float32)
    params = init_params(k_p, in_features, dt_rank, dim_inner, d_state)

    y = ssm_forward(x, params)
    y = jax.block_until_ready(y)

    y_ref = ssm_ref(x, params)
    assert y.shape == (batch, seq, dim_inner)
    assert jnp.allclose(y, y_ref, atol=1e-4, rtol=1e-4), "mismatch vs reference"

    print("KERNEL_OK")
</pallas_src>

<mosaic_0001>
module attributes {stable_mosaic.version = 11 : i64} {
  func.func @_ssm_kernel(%arg0: i32, %arg1: memref<1x8x32xf32, #tpu.memory_space<vmem>>, %arg2: memref<32x8xf32, #tpu.memory_space<vmem>>, %arg3: memref<1x8xf32, #tpu.memory_space<vmem>>, %arg4: memref<32x16xf32, #tpu.memory_space<vmem>>, %arg5: memref<1x16xf32, #tpu.memory_space<vmem>>, %arg6: memref<32x16xf32, #tpu.memory_space<vmem>>, %arg7: memref<1x16xf32, #tpu.memory_space<vmem>>, %arg8: memref<8x32xf32, #tpu.memory_space<vmem>>, %arg9: memref<1x32xf32, #tpu.memory_space<vmem>>, %arg10: memref<32x16xf32, #tpu.memory_space<vmem>>, %arg11: memref<1x32xf32, #tpu.memory_space<vmem>>, %arg12: memref<1x8x32xf32, #tpu.memory_space<vmem>>, %arg13: memref<8x32x16xf32, #tpu.memory_space<vmem>>, %arg14: memref<8x32x16xf32, #tpu.memory_space<vmem>>) attributes {dimension_semantics = [#tpu.dimension_semantics<parallel>], iteration_bounds = array<i64: 2>, scalar_prefetch = 0 : i64, scratch_operands = 2 : i64, tpu.core_type = #tpu.core_type<tc>, window_params = [{transform_indices = @transform_0, window_bounds = array<i64: 1, 8, 32>}, {pipeline_mode = #tpu.pipeline_mode<synchronous>, transform_indices = @transform_1, window_bounds = array<i64: 32, 8>}, {pipeline_mode = #tpu.pipeline_mode<synchronous>, transform_indices = @transform_2, window_bounds = array<i64: 1, 8>}, {pipeline_mode = #tpu.pipeline_mode<synchronous>, transform_indices = @transform_3, window_bounds = array<i64: 32, 16>}, {pipeline_mode = #tpu.pipeline_mode<synchronous>, transform_indices = @transform_4, window_bounds = array<i64: 1, 16>}, {pipeline_mode = #tpu.pipeline_mode<synchronous>, transform_indices = @transform_5, window_bounds = array<i64: 32, 16>}, {pipeline_mode = #tpu.pipeline_mode<synchronous>, transform_indices = @transform_6, window_bounds = array<i64: 1, 16>}, {pipeline_mode = #tpu.pipeline_mode<synchronous>, transform_indices = @transform_7, window_bounds = array<i64: 8, 32>}, {pipeline_mode = #tpu.pipeline_mode<synchronous>, transform_indices = @transform_8, window_bounds = array<i64: 1, 32>}, {pipeline_mode = #tpu.pipeline_mode<synchronous>, transform_indices = @transform_9, window_bounds = array<i64: 32, 16>}, {pipeline_mode = #tpu.pipeline_mode<synchronous>, transform_indices = @transform_10, window_bounds = array<i64: 1, 32>}, {transform_indices = @transform_11, window_bounds = array<i64: 1, 8, 32>}]} {
    %c0 = arith.constant 0 : index
    %c0_0 = arith.constant 0 : index
    %c0_1 = arith.constant 0 : index
    %0 = vector.load %arg1[%c0, %c0_0, %c0_1] : memref<1x8x32xf32, #tpu.memory_space<vmem>>, vector<1x8x32xf32>
    %1 = vector.shape_cast %0 : vector<1x8x32xf32> to vector<8x32xf32>
    %c0_2 = arith.constant 0 : index
    %c0_3 = arith.constant 0 : index
    %2 = vector.load %arg2[%c0_2, %c0_3] : memref<32x8xf32, #tpu.memory_space<vmem>>, vector<32x8xf32>
    %cst = arith.constant dense<0.000000e+00> : vector<8x8xf32>
    %3 = tpu.matmul %1, %2, %cst {dimension_numbers = #tpu.dot_dimension_numbers<[1], [0], [0], [1], [0, 0, 1, 1], [], []>} : vector<8x32xf32>, vector<32x8xf32>, vector<8x8xf32> -> vector<8x8xf32>
    %c0_4 = arith.constant 0 : index
    %c0_5 = arith.constant 0 : index
    %4 = vector.load %arg3[%c0_4, %c0_5] : memref<1x8xf32, #tpu.memory_space<vmem>>, vector<1x8xf32>
    %5 = vector.broadcast %4 : vector<1x8xf32> to vector<8x8xf32>
    %6 = arith.addf %3, %5 : vector<8x8xf32>
    %c0_6 = arith.constant 0 : index
    %c0_7 = arith.constant 0 : index
    %7 = vector.load %arg4[%c0_6, %c0_7] : memref<32x16xf32, #tpu.memory_space<vmem>>, vector<32x16xf32>
    %cst_8 = arith.constant dense<0.000000e+00> : vector<8x16xf32>
    %8 = tpu.matmul %1, %7, %cst_8 {dimension_numbers = #tpu.dot_dimension_numbers<[1], [0], [0], [1], [0, 0, 1, 1], [], []>} : vector<8x32xf32>, vector<32x16xf32>, vector<8x16xf32> -> vector<8x16xf32>
    %c0_9 = arith.constant 0 : index
    %c0_10 = arith.constant 0 : index
    %9 = vector.load %arg5[%c0_9, %c0_10] : memref<1x16xf32, #tpu.memory_space<vmem>>, vector<1x16xf32>
    %10 = vector.broadcast %9 : vector<1x16xf32> to vector<8x16xf32>
    %11 = arith.addf %8, %10 : vector<8x16xf32>
    %c0_11 = arith.constant 0 : index
    %c0_12 = arith.constant 0 : index
    %12 = vector.load %arg6[%c0_11, %c0_12] : memref<32x16xf32, #tpu.memory_space<vmem>>, vector<32x16xf32>
    %cst_13 = arith.constant dense<0.000000e+00> : vector<8x16xf32>
    %13 = tpu.matmul %1, %12, %cst_13 {dimension_numbers = #tpu.dot_dimension_numbers<[1], [0], [0], [1], [0, 0, 1, 1], [], []>} : vector<8x32xf32>, vector<32x16xf32>, vector<8x16xf32> -> vector<8x16xf32>
    %c0_14 = arith.constant 0 : index
    %c0_15 = arith.constant 0 : index
    %14 = vector.load %arg7[%c0_14, %c0_15] : memref<1x16xf32, #tpu.memory_space<vmem>>, vector<1x16xf32>
    %15 = vector.broadcast %14 : vector<1x16xf32> to vector<8x16xf32>
    %16 = arith.addf %13, %15 : vector<8x16xf32>
    %c0_16 = arith.constant 0 : index
    %c0_17 = arith.constant 0 : index
    %17 = vector.load %arg8[%c0_16, %c0_17] : memref<8x32xf32, #tpu.memory_space<vmem>>, vector<8x32xf32>
    %cst_18 = arith.constant dense<0.000000e+00> : vector<8x32xf32>
    %18 = tpu.matmul %6, %17, %cst_18 {dimension_numbers = #tpu.dot_dimension_numbers<[1], [0], [0], [1], [0, 0, 1, 1], [], []>} : vector<8x8xf32>, vector<8x32xf32>, vector<8x32xf32> -> vector<8x32xf32>
    %c0_19 = arith.constant 0 : index
    %c0_20 = arith.constant 0 : index
    %19 = vector.load %arg9[%c0_19, %c0_20] : memref<1x32xf32, #tpu.memory_space<vmem>>, vector<1x32xf32>
    %20 = vector.broadcast %19 : vector<1x32xf32> to vector<8x32xf32>
    %21 = arith.addf %18, %20 : vector<8x32xf32>
    %cst_21 = arith.constant 0.000000e+00 : f32
    %22 = vector.broadcast %cst_21 : f32 to vector<8x32xf32>
    %23 = arith.maximumf %21, %22 : vector<8x32xf32>
    %24 = math.absf %21 : vector<8x32xf32>
    %cst_22 = arith.constant 0.000000e+00 : f32
    %25 = vector.broadcast %cst_22 : f32 to vector<8x32xf32>
    %26 = arith.subf %25, %24 : vector<8x32xf32>
    %27 = math.exp %26 : vector<8x32xf32>
    %cst_23 = arith.constant 1.000000e+00 : f32
    %28 = vector.broadcast %cst_23 : f32 to vector<8x32xf32>
    %29 = arith.addf %28, %27 : vector<8x32xf32>
    %30 = math.log %29 : vector<8x32xf32>
    %31 = arith.addf %23, %30 : vector<8x32xf32>
    %c0_24 = arith.constant 0 : index
    %c0_25 = arith.constant 0 : index
    %32 = vector.load %arg10[%c0_24, %c0_25] : memref<32x16xf32, #tpu.memory_space<vmem>>, vector<32x16xf32>
    %33 = math.exp %32 : vector<32x16xf32>
    %cst_26 = arith.constant 0.000000e+00 : f32
    %34 = vector.broadcast %cst_26 : f32 to vector<32x16xf32>
    %35 = arith.subf %34, %33 : vector<32x16xf32>
    %36 = vector.shape_cast %31 : vector<8x32xf32> to vector<8x32x1xf32>
    %37 = vector.shape_cast %35 : vector<32x16xf32> to vector<1x32x16xf32>
    %38 = vector.broadcast %36 : vector<8x32x1xf32> to vector<8x32x16xf32>
    %39 = vector.broadcast %37 : vector<1x32x16xf32> to vector<8x32x16xf32>
    %40 = arith.mulf %38, %39 : vector<8x32x16xf32>
    %41 = math.exp %40 : vector<8x32x16xf32>
    %c0_27 = arith.constant 0 : index
    %c0_28 = arith.constant 0 : index
    %c0_29 = arith.constant 0 : index
    %42 = vector.load %arg13[%c0_27, %c0_28, %c0_29] : memref<8x32x16xf32, #tpu.memory_space<vmem>>, vector<8x32x16xf32>
    tpu.vector_store %arg13[%c0_27, %c0_28, %c0_29], %41 {strides = array<i32>} : memref<8x32x16xf32, #tpu.memory_space<vmem>>, vector<8x32x16xf32>,
    %43 = arith.mulf %31, %1 : vector<8x32xf32>
    %44 = vector.shape_cast %43 : vector<8x32xf32> to vector<8x32x1xf32>
    %45 = vector.shape_cast %11 : vector<8x16xf32> to vector<8x1x16xf32>
    %46 = vector.broadcast %44 : vector<8x32x1xf32> to vector<8x32x16xf32>
    %47 = vector.broadcast %45 : vector<8x1x16xf32> to vector<8x32x16xf32>
    %48 = arith.mulf %46, %47 : vector<8x32x16xf32>
    %c0_30 = arith.constant 0 : index
    %c0_31 = arith.constant 0 : index
    %c0_32 = arith.constant 0 : index
    %49 = vector.load %arg14[%c0_30, %c0_31, %c0_32] : memref<8x32x16xf32, #tpu.memory_space<vmem>>, vector<8x32x16xf32>
    tpu.vector_store %arg14[%c0_30, %c0_31, %c0_32], %48 {strides = array<i32>} : memref<8x32x16xf32, #tpu.memory_space<vmem>>, vector<8x32x16xf32>,
    %cst_33 = arith.constant 0.000000e+00 : f32
    %50 = vector.broadcast %cst_33 : f32 to vector<32x16xf32>
    %c0_i32 = arith.constant 0 : i32
    %51 = arith.index_cast %c0_i32 : i32 to index
    %c0_34 = arith.constant 0 : index
    %c0_35 = arith.constant 0 : index
    %52 = vector.load %arg13[%51, %c0_34, %c0_35] : memref<8x32x16xf32, #tpu.memory_space<vmem>>, vector<1x32x16xf32>
    %53 = vector.shape_cast %52 : vector<1x32x16xf32> to vector<32x16xf32>
    %54 = arith.mulf %53, %50 : vector<32x16xf32>
    %55 = arith.index_cast %c0_i32 : i32 to index
    %c0_36 = arith.constant 0 : index
    %c0_37 = arith.constant 0 : index
    %56 = vector.load %arg14[%55, %c0_36, %c0_37] : memref<8x32x16xf32, #tpu.memory_space<vmem>>, vector<1x32x16xf32>
    %57 = vector.shape_cast %56 : vector<1x32x16xf32> to vector<32x16xf32>
    %58 = arith.addf %54, %57 : vector<32x16xf32>
    %59 = arith.index_cast %c0_i32 : i32 to index
    %c0_38 = arith.constant 0 : index
    %c0_39 = arith.constant 0 : index
    %60 = vector.load %arg14[%59, %c0_38, %c0_39] : memref<8x32x16xf32, #tpu.memory_space<vmem>>, vector<1x32x16xf32>
    %61 = vector.shape_cast %60 : vector<1x32x16xf32> to vector<32x16xf32>
    %62 = vector.shape_cast %58 : vector<32x16xf32> to vector<1x32x16xf32>
    tpu.vector_store %arg14[%59, %c0_38, %c0_39], %62 {strides = array<i32>} : memref<8x32x16xf32, #tpu.memory_space<vmem>>, vector<1x32x16xf32>,
    %c1_i32 = arith.constant 1 : i32
    %63 = arith.index_cast %c1_i32 : i32 to index
    %c0_40 = arith.constant 0 : index
    %c0_41 = arith.constant 0 : index
    %64 = vector.load %arg13[%63, %c0_40, %c0_41] : memref<8x32x16xf32, #tpu.memory_space<vmem>>, vector<1x32x16xf32>
    %65 = vector.shape_cast %64 : vector<1x32x16xf32> to vector<32x16xf32>
    %66 = arith.mulf %65, %58 : vector<32x16xf32>
    %67 = arith.index_cast %c1_i32 : i32 to index
    %c0_42 = arith.constant 0 : index
    %c0_43 = arith.constant 0 : index
    %68 = vector.load %arg14[%67, %c0_42, %c0_43] : memref<8x32x16xf32, #tpu.memory_space<vmem>>, vector<1x32x16xf32>
    %69 = vector.shape_cast %68 : vector<1x32x16xf32> to vector<32x16xf32>
    %70 = arith.addf %66, %69 : vector<32x16xf32>
    %71 = arith.index_cast %c1_i32 : i32 to index
    %c0_44 = arith.constant 0 : index
    %c0_45 = arith.constant 0 : index
    %72 = vector.load %arg14[%71, %c0_44, %c0_45] : memref<8x32x16xf32, #tpu.memory_space<vmem>>, vector<1x32x16xf32>
    %73 = vector.shape_cast %72 : vector<1x32x16xf32> to vector<32x16xf32>
    %74 = vector.shape_cast %70 : vector<32x16xf32> to vector<1x32x16xf32>
    tpu.vector_store %arg14[%71, %c0_44, %c0_45], %74 {strides = array<i32>} : memref<8x32x16xf32, #tpu.memory_space<vmem>>, vector<1x32x16xf32>,
    %c2_i32 = arith.constant 2 : i32
    %75 = arith.index_cast %c2_i32 : i32 to index
    %c0_46 = arith.constant 0 : index
    %c0_47 = arith.constant 0 : index
    %76 = vector.load %arg13[%75, %c0_46, %c0_47] : memref<8x32x16xf32, #tpu.memory_space<vmem>>, vector<1x32x16xf32>
    %77 = vector.shape_cast %76 : vector<1x32x16xf32> to vector<32x16xf32>
    %78 = arith.mulf %77, %70 : vector<32x16xf32>
    %79 = arith.index_cast %c2_i32 : i32 to index
    %c0_48 = arith.constant 0 : index
    %c0_49 = arith.constant 0 : index
    %80 = vector.load %arg14[%79, %c0_48, %c0_49] : memref<8x32x16xf32, #tpu.memory_space<vmem>>, vector<1x32x16xf32>
    %81 = vector.shape_cast %80 : vector<1x32x16xf32> to vector<32x16xf32>
    %82 = arith.addf %78, %81 : vector<32x16xf32>
    %83 = arith.index_cast %c2_i32 : i32 to index
    %c0_50 = arith.constant 0 : index
    %c0_51 = arith.constant 0 : index
    %84 = vector.load %arg14[%83, %c0_50, %c0_51] : memref<8x32x16xf32, #tpu.memory_space<vmem>>, vector<1x32x16xf32>
    %85 = vector.shape_cast %84 : vector<1x32x16xf32> to vector<32x16xf32>
    %86 = vector.shape_cast %82 : vector<32x16xf32> to vector<1x32x16xf32>
    tpu.vector_store %arg14[%83, %c0_50, %c0_51], %86 {strides = array<i32>} : memref<8x32x16xf32, #tpu.memory_space<vmem>>, vector<1x32x16xf32>,
    %c3_i32 = arith.constant 3 : i32
    %87 = arith.index_cast %c3_i32 : i32 to index
    %c0_52 = arith.constant 0 : index
    %c0_53 = arith.constant 0 : index
    %88 = vector.load %arg13[%87, %c0_52, %c0_53] : memref<8x32x16xf32, #tpu.memory_space<vmem>>, vector<1x32x16xf32>
    %89 = vector.shape_cast %88 : vector<1x32x16xf32> to vector<32x16xf32>
    %90 = arith.mulf %89, %82 : vector<32x16xf32>
    %91 = arith.index_cast %c3_i32 : i32 to index
    %c0_54 = arith.constant 0 : index
    %c0_55 = arith.constant 0 : index
    %92 = vector.load %arg14[%91, %c0_54, %c0_55] : memref<8x32x16xf32, #tpu.memory_space<vmem>>, vector<1x32x16xf32>
    %93 = vector.shape_cast %92 : vector<1x32x16xf32> to vector<32x16xf32>
    %94 = arith.addf %90, %93 : vector<32x16xf32>
    %95 = arith.index_cast %c3_i32 : i32 to index
    %c0_56 = arith.constant 0 : index
    %c0_57 = arith.constant 0 : index
    %96 = vector.load %arg14[%95, %c0_56, %c0_57] : memref<8x32x16xf32, #tpu.memory_space<vmem>>, vector<1x32x16xf32>
    %97 = vector.shape_cast %96 : vector<1x32x16xf32> to vector<32x16xf32>
    %98 = vector.shape_cast %94 : vector<32x16xf32> to vector<1x32x16xf32>
    tpu.vector_store %arg14[%95, %c0_56, %c0_57], %98 {strides = array<i32>} : memref<8x32x16xf32, #tpu.memory_space<vmem>>, vector<1x32x16xf32>,
    %c4_i32 = arith.constant 4 : i32
    %99 = arith.index_cast %c4_i32 : i32 to index
    %c0_58 = arith.constant 0 : index
    %c0_59 = arith.constant 0 : index
    %100 = vector.load %arg13[%99, %c0_58, %c0_59] : memref<8x32x16xf32, #tpu.memory_space<vmem>>, vector<1x32x16xf32>
    %101 = vector.shape_cast %100 : vector<1x32x16xf32> to vector<32x16xf32>
    %102 = arith.mulf %101, %94 : vector<32x16xf32>
    %103 = arith.index_cast %c4_i32 : i32 to index
    %c0_60 = arith.constant 0 : index
    %c0_61 = arith.constant 0 : index
    %104 = vector.load %arg14[%103, %c0_60, %c0_61] : memref<8x32x16xf32, #tpu.memory_space<vmem>>, vector<1x32x16xf32>
    %105 = vector.shape_cast %104 : vector<1x32x16xf32> to vector<32x16xf32>
    %106 = arith.addf %102, %105 : vector<32x16xf32>
    %107 = arith.index_cast %c4_i32 : i32 to index
    %c0_62 = arith.constant 0 : index
    %c0_63 = arith.constant 0 : index
    %108 = vector.load %arg14[%107, %c0_62, %c0_63] : memref<8x32x16xf32, #tpu.memory_space<vmem>>, vector<1x32x16xf32>
    %109 = vector.shape_cast %108 : vector<1x32x16xf32> to vector<32x16xf32>
    %110 = vector.shape_cast %106 : vector<32x16xf32> to vector<1x32x16xf32>
    tpu.vector_store %arg14[%107, %c0_62, %c0_63], %110 {strides = array<i32>} : memref<8x32x16xf32, #tpu.memory_space<vmem>>, vector<1x32x16xf32>,
    %c5_i32 = arith.constant 5 : i32
    %111 = arith.index_cast %c5_i32 : i32 to index
    %c0_64 = arith.constant 0 : index
    %c0_65 = arith.constant 0 : index
    %112 = vector.load %arg13[%111, %c0_64, %c0_65] : memref<8x32x16xf32, #tpu.memory_space<vmem>>, vector<1x32x16xf32>
    %113 = vector.shape_cast %112 : vector<1x32x16xf32> to vector<32x16xf32>
    %114 = arith.mulf %113, %106 : vector<32x16xf32>
    %115 = arith.index_cast %c5_i32 : i32 to index
    %c0_66 = arith.constant 0 : index
    %c0_67 = arith.constant 0 : index
    %116 = vector.load %arg14[%115, %c0_66, %c0_67] : memref<8x32x16xf32, #tpu.memory_space<vmem>>, vector<1x32x16xf32>
    %117 = vector.shape_cast %116 : vector<1x32x16xf32> to vector<32x16xf32>
    %118 = arith.addf %114, %117 : vector<32x16xf32>
    %119 = arith.index_cast %c5_i32 : i32 to index
    %c0_68 = arith.constant 0 : index
    %c0_69 = arith.constant 0 : index
    %120 = vector.load %arg14[%119, %c0_68, %c0_69] : memref<8x32x16xf32, #tpu.memory_space<vmem>>, vector<1x32x16xf32>
    %121 = vector.shape_cast %120 : vector<1x32x16xf32> to vector<32x16xf32>
    %122 = vector.shape_cast %118 : vector<32x16xf32> to vector<1x32x16xf32>
    tpu.vector_store %arg14[%119, %c0_68, %c0_69], %122 {strides = array<i32>} : memref<8x32x16xf32, #tpu.memory_space<vmem>>, vector<1x32x16xf32>,
    %c6_i32 = arith.constant 6 : i32
    %123 = arith.index_cast %c6_i32 : i32 to index
    %c0_70 = arith.constant 0 : index
    %c0_71 = arith.constant 0 : index
    %124 = vector.load %arg13[%123, %c0_70, %c0_71] : memref<8x32x16xf32, #tpu.memory_space<vmem>>, vector<1x32x16xf32>
    %125 = vector.shape_cast %124 : vector<1x32x16xf32> to vector<32x16xf32>
    %126 = arith.mulf %125, %118 : vector<32x16xf32>
    %127 = arith.index_cast %c6_i32 : i32 to index
    %c0_72 = arith.constant 0 : index
    %c0_73 = arith.constant 0 : index
    %128 = vector.load %arg14[%127, %c0_72, %c0_73] : memref<8x32x16xf32, #tpu.memory_space<vmem>>, vector<1x32x16xf32>
    %129 = vector.shape_cast %128 : vector<1x32x16xf32> to vector<32x16xf32>
    %130 = arith.addf %126, %129 : vector<32x16xf32>
    %131 = arith.index_cast %c6_i32 : i32 to index
    %c0_74 = arith.constant 0 : index
    %c0_75 = arith.constant 0 : index
    %132 = vector.load %arg14[%131, %c0_74, %c0_75] : memref<8x32x16xf32, #tpu.memory_space<vmem>>, vector<1x32x16xf32>
    %133 = vector.shape_cast %132 : vector<1x32x16xf32> to vector<32x16xf32>
    %134 = vector.shape_cast %130 : vector<32x16xf32> to vector<1x32x16xf32>
    tpu.vector_store %arg14[%131, %c0_74, %c0_75], %134 {strides = array<i32>} : memref<8x32x16xf32, #tpu.memory_space<vmem>>, vector<1x32x16xf32>,
    %c7_i32 = arith.constant 7 : i32
    %135 = arith.index_cast %c7_i32 : i32 to index
    %c0_76 = arith.constant 0 : index
    %c0_77 = arith.constant 0 : index
    %136 = vector.load %arg13[%135, %c0_76, %c0_77] : memref<8x32x16xf32, #tpu.memory_space<vmem>>, vector<1x32x16xf32>
    %137 = vector.shape_cast %136 : vector<1x32x16xf32> to vector<32x16xf32>
    %138 = arith.mulf %137, %130 : vector<32x16xf32>
    %139 = arith.index_cast %c7_i32 : i32 to index
    %c0_78 = arith.constant 0 : index
    %c0_79 = arith.constant 0 : index
    %140 = vector.load %arg14[%139, %c0_78, %c0_79] : memref<8x32x16xf32, #tpu.memory_space<vmem>>, vector<1x32x16xf32>
    %141 = vector.shape_cast %140 : vector<1x32x16xf32> to vector<32x16xf32>
    %142 = arith.addf %138, %141 : vector<32x16xf32>
    %143 = arith.index_cast %c7_i32 : i32 to index
    %c0_80 = arith.constant 0 : index
    %c0_81 = arith.constant 0 : index
    %144 = vector.load %arg14[%143, %c0_80, %c0_81] : memref<8x32x16xf32, #tpu.memory_space<vmem>>, vector<1x32x16xf32>
    %145 = vector.shape_cast %144 : vector<1x32x16xf32> to vector<32x16xf32>
    %146 = vector.shape_cast %142 : vector<32x16xf32> to vector<1x32x16xf32>
    tpu.vector_store %arg14[%143, %c0_80, %c0_81], %146 {strides = array<i32>} : memref<8x32x16xf32, #tpu.memory_space<vmem>>, vector<1x32x16xf32>,
    %c8_i32 = arith.constant 8 : i32
    %c0_82 = arith.constant 0 : index
    %c0_83 = arith.constant 0 : index
    %c0_84 = arith.constant 0 : index
    %147 = vector.load %arg14[%c0_82, %c0_83, %c0_84] : memref<8x32x16xf32, #tpu.memory_space<vmem>>, vector<8x32x16xf32>
    %148 = vector.shape_cast %16 : vector<8x16xf32> to vector<8x1x16xf32>
    %149 = vector.broadcast %148 : vector<8x1x16xf32> to vector<8x32x16xf32>
    %150 = arith.mulf %147, %149 : vector<8x32x16xf32>
    %cst_85 = arith.constant dense<0.000000e+00> : vector<8x32xf32>
    %151 = vector.multi_reduction <add>, %150, %cst_85 [2] : vector<8x32x16xf32> to vector<8x32xf32>
    %c0_86 = arith.constant 0 : index
    %c0_87 = arith.constant 0 : index
    %152 = vector.load %arg11[%c0_86, %c0_87] : memref<1x32xf32, #tpu.memory_space<vmem>>, vector<1x32xf32>
    %153 = vector.broadcast %152 : vector<1x32xf32> to vector<8x32xf32>
    %154 = arith.mulf %153, %1 : vector<8x32xf32>
    %155 = arith.addf %151, %154 : vector<8x32xf32>
    %c0_88 = arith.constant 0 : index
    %c0_89 = arith.constant 0 : index
    %c0_90 = arith.constant 0 : index
    %156 = vector.load %arg12[%c0_88, %c0_89, %c0_90] : memref<1x8x32xf32, #tpu.memory_space<vmem>>, vector<1x8x32xf32>
    %157 = vector.shape_cast %156 : vector<1x8x32xf32> to vector<8x32xf32>
    %158 = vector.shape_cast %155 : vector<8x32xf32> to vector<1x8x32xf32>
    tpu.vector_store %arg12[%c0_88, %c0_89, %c0_90], %158 {strides = array<i32>} : memref<1x8x32xf32, #tpu.memory_space<vmem>>, vector<1x8x32xf32>,
    return
  }
  func.func @transform_0(%arg0: i32) -> (i32, i32, i32) {
    %c0_i32 = arith.constant 0 : i32
    %c0_i32_0 = arith.constant 0 : i32
    %c0_i32_1 = arith.constant 0 : i32
    return %arg0, %c0_i32, %c0_i32_0 : i32, i32, i32
  }
  func.func @transform_1(%arg0: i32) -> (i32, i32) {
    %c0_i32 = arith.constant 0 : i32
    %c0_i32_0 = arith.constant 0 : i32
    %c0_i32_1 = arith.constant 0 : i32
    return %c0_i32, %c0_i32_0 : i32, i32
  }
  func.func @transform_2(%arg0: i32) -> (i32, i32) {
    %c0_i32 = arith.constant 0 : i32
    %c0_i32_0 = arith.constant 0 : i32
    %c0_i32_1 = arith.constant 0 : i32
    return %c0_i32, %c0_i32_0 : i32, i32
  }
  func.func @transform_3(%arg0: i32) -> (i32, i32) {
    %c0_i32 = arith.constant 0 : i32
    %c0_i32_0 = arith.constant 0 : i32
    %c0_i32_1 = arith.constant 0 : i32
    return %c0_i32, %c0_i32_0 : i32, i32
  }
  func.func @transform_4(%arg0: i32) -> (i32, i32) {
    %c0_i32 = arith.constant 0 : i32
    %c0_i32_0 = arith.constant 0 : i32
    %c0_i32_1 = arith.constant 0 : i32
    return %c0_i32, %c0_i32_0 : i32, i32
  }
  func.func @transform_5(%arg0: i32) -> (i32, i32) {
    %c0_i32 = arith.constant 0 : i32
    %c0_i32_0 = arith.constant 0 : i32
    %c0_i32_1 = arith.constant 0 : i32
    return %c0_i32, %c0_i32_0 : i32, i32
  }
  func.func @transform_6(%arg0: i32) -> (i32, i32) {
    %c0_i32 = arith.constant 0 : i32
    %c0_i32_0 = arith.constant 0 : i32
    %c0_i32_1 = arith.constant 0 : i32
    return %c0_i32, %c0_i32_0 : i32, i32
  }
  func.func @transform_7(%arg0: i32) -> (i32, i32) {
    %c0_i32 = arith.constant 0 : i32
    %c0_i32_0 = arith.constant 0 : i32
    %c0_i32_1 = arith.constant 0 : i32
    return %c0_i32, %c0_i32_0 : i32, i32
  }
  func.func @transform_8(%arg0: i32) -> (i32, i32) {
    %c0_i32 = arith.constant 0 : i32
    %c0_i32_0 = arith.constant 0 : i32
    %c0_i32_1 = arith.constant 0 : i32
    return %c0_i32, %c0_i32_0 : i32, i32
  }
  func.func @transform_9(%arg0: i32) -> (i32, i32) {
    %c0_i32 = arith.constant 0 : i32
    %c0_i32_0 = arith.constant 0 : i32
    %c0_i32_1 = arith.constant 0 : i32
    return %c0_i32, %c0_i32_0 : i32, i32
  }
  func.func @transform_10(%arg0: i32) -> (i32, i32) {
    %c0_i32 = arith.constant 0 : i32
    %c0_i32_0 = arith.constant 0 : i32
    %c0_i32_1 = arith.constant 0 : i32
    return %c0_i32, %c0_i32_0 : i32, i32
  }
  func.func @transform_11(%arg0: i32) -> (i32, i32, i32) {
    %c0_i32 = arith.constant 0 : i32
    %c0_i32_0 = arith.constant 0 : i32
    %c0_i32_1 = arith.constant 0 : i32
    return %arg0, %c0_i32, %c0_i32_0 : i32, i32, i32
  }
}

</mosaic_0001>

<bundles_post_ra>
// kernel: tpu_custom_call.1
= control target key start
LH: loop header
LB: loop body
LE: loop exit
PB: predicated region body
PF: predicated region fallthrough
CT: control target
= control target key end

     0   :  { %16 = vsyncpa [#allocation5], 0  ;;  %s3425_s0 = inlined_call_operand.vmem [shape: f32[2,8,32], index: 0, kind: input, shape index: {}]   ;;  %s3426_s1 = inlined_call_operand.vmem [shape: f32[32,8], index: 1, kind: input, shape index: {}]   ;;  %s3427_s2 = inlined_call_operand.vmem [shape: f32[1,8], index: 2, kind: input, shape index: {}]   ;;  %s3428_s3 = inlined_call_operand.vmem [shape: f32[32,16], index: 3, kind: input, shape index: {}]   ;;  %s3429_s4 = inlined_call_operand.vmem [shape: f32[1,16], index: 4, kind: input, shape index: {}]   ;;  %s3430_s5 = inlined_call_operand.vmem [shape: f32[32,16], index: 5, kind: input, shape index: {}]   ;;  %s3431_s6 = inlined_call_operand.vmem [shape: f32[1,16], index: 6, kind: input, shape index: {}]   ;;  %s3432_s7 = inlined_call_operand.vmem [shape: f32[8,32], index: 7, kind: input, shape index: {}]   ;;  %s3433_s8 = inlined_call_operand.vmem [shape: f32[1,32], index: 8, kind: input, shape index: {}]   ;;  %s3434_s9 = inlined_call_operand.vmem [shape: f32[32,16], index: 9, kind: input, shape index: {}]   ;;  %s3435_s10 = inlined_call_operand.vmem [shape: f32[1,32], index: 10, kind: input, shape index: {}]   ;;  %s3436_s11 = inlined_call_operand.hbm [shape: f32[2,8,32], index: 11, kind: output, shape index: {}]  }
   0x1   :  { %18 = vsyncpa [#allocation5 + $0x1], 0  ;;  %s2695_s17 = smov 0   ;;  %s2697_s18 = smov 0  }
   0x2   :  { %s2699_s19 = smov 0   ;;  %s2701_s20 = smov 0  }
   0x3 LB: > { %s2716_s21 = sadd.s32 4294967295, %s2627_s20   ;;  %s2351_s22 = sadd.s32 4294967294, %s2627_s20   ;;  %s2627_s20 = sphi %s2701_s20, %s3452_s20   ;;  %s2623_s19 = sphi %s2699_s19, %s3451_s19   ;;  %s2619_s18 = sphi %s2697_s18, %s3450_s18   ;;  %s2615_s17 = sphi %s2695_s17, %s3449_s17  }
   0x4   : > { %s2720_s23 = sadd.s32 1, %s2627_s20   ;;  %s267_s24 = sadd.s32 1, %s2623_s19 }
   0x5   : > { %s264_s25 = ssub.s32 %s2627_s20, %s2720_s23  ;;  %p277_p0 = scmp.ne.s32.totalorder %s2623_s19, %s2619_s18 }
   0x6   : > { %p265_p1 = scmp.eq.s32.totalorder %s264_s25, 0  ;;  %p278_p2 = scmp.eq.s32.totalorder %s2716_s21, 1 }
   0x7   : > { %p283_p3 = scmp.ne.s32.totalorder %s2619_s18, %s2615_s17  ;;  %p284_p4 = scmp.eq.s32.totalorder %s2351_s22, 1 }
   0x8   : > { %s2731_s26 = scalar_select %p265_p1, %s2623_s19, %s267_s24  }
   0x9   : > { %p2733_p5 = por %p278_p2, %p277_p0  ;;  %p2737_p6 = por %p284_p4, %p283_p3 }
   0xa   : > { %p2354_p7 = scmp.ge.s32.totalorder %s2627_s20, 1  ;;  %p339_p8 = scmp.lt.s32.totalorder %s2627_s20, 3 }
   0xc   : > { %p340_p9 = pnand %p2354_p7, %p339_p8 }
   0xe   : > { %343 = sbr.rel (%p340_p9) target bundleno = 1053 (0x41d), region = 64 }
  0x15   : > { %v383_v0 = vld [vmem:[%s3426_s1] sm:$0xff]  ;;  %v384_v1 = vld [vmem:[%s3426_s1 + $0x8] sm:$0xff]  ;;  %v385_v2 = vld [vmem:[%s3426_s1 + $0x10] sm:$0xff]  ;;  %v2629_v3 = vmov 0.0|0.0   ;;  %vm2630_vm0 = vmmov 0   ;;  %v2631_v6 = vmov 0.0   ;;  %v3437_v17 = vlaneseq }
  0x16   : > { %2425 = vmatprep.subr.bf16.mxu0 %v2629_v3  ;;  %v2426_v4 = vpack.c.bf16 %v384_v1, %v383_v0  ;;  %v386_v5 = vld [vmem:[%s3426_s1 + $0x18] sm:$0xff]  ;;  %2395 = vmatprep.mubr.msk.f32.mxu0 %vm2630_vm0, %v2631_v6  ;;  %p378_p10 = scmp.lt.s32.totalorder %s2716_s21, 1  ;;  %v468_v7 = vld [vmem:[%s3428_s3] sm:$0xff]  ;;  %v469_v8 = vld [vmem:[%s3428_s3 + $0x8] sm:$0xff]  ;;  %vm394_vm1 = vcmask 261120   ;;  %vm638_vm2 = vcmask 64512  }
  0x17   : > { %2431 = vmatprep.subr.bf16.mxu1 %v2629_v3  ;;  %v470_v9 = vld [vmem:[%s3428_s3 + $0x10] sm:$0xff]  ;;  %v471_v10 = vld [vmem:[%s3428_s3 + $0x18] sm:$0xff]  ;;  %2406 = vmatprep.mubr.msk.f32.mxu1 %vm2630_vm0, %v2631_v6  ;;  %v2429_v11 = vpack.c.bf16 %v386_v5, %v385_v2  ;;  %v2432_v12 = vpack.c.bf16 %v469_v8, %v468_v7  ;;  %v630_v15 = vld [vmem:[%s3432_s7] sm:$0xff]  ;;  %v2797_v19 = vshrl.u32 %v3437_v17, 7  ;;  %vm985_vm3 = vcmask 130048   ;;  %s375_s25 = sand.u32 1, %s2619_s18  }
  0x18   : > { %2427 = vmatpush3.bf16.msra.mxu0 %v2426_v4  ;;  %s379_s16 = scalar_select %p378_p10, %s2716_s21, 1  ;;  %v2435_v13 = vpack.c.bf16 %v471_v10, %v470_v9  ;;  %v2365_v16 = vld [vmem:[%s3435_s10] ss:$0 sm:$0xff]  ;;  %v550_v37 = vld [vmem:[%s3430_s5 + $0x8] sm:$0xff]  ;;  %v551_v39 = vld [vmem:[%s3430_s5 + $0x10] sm:$0xff]  ;;  %vm2113_vm4 = vcmask 130112  }
  0x19   : > { %2428 = vmatprep.subr.bf16.mxu0 %v2629_v3  ;;  %2433 = vmatpush3.bf16.msra.mxu1 %v2432_v12  ;;  %3442 = vst [vmem:[#allocation7_spill] sm:$0xff] %v2797_v19  ;;  %v2800_v20 = vsub.s32 0, %v2797_v19  ;;  %v2803_v21 = vsub.s32 1, %v2797_v19  ;;  %v2810_v24 = vsub.s32 2, %v2797_v19  ;;  %v2815_v26 = vsub.s32 3, %v2797_v19  ;;  %v549_v36 = vld [vmem:[%s3430_s5] sm:$0xff] }
  0x1a   : > { %s2356_s22 = sshll.u32 %s379_s16, 3  ;;  %2434 = vmatprep.subr.bf16.mxu1 %v2629_v3  ;;  %v2357_v28 = vld [vmem:[%s3427_s2] ss:$0 sm:$0xff]  ;;  %v2825_v34 = vsub.s32 4, %v2797_v19  ;;  %v2438_v38 = vpack.c.bf16 %v550_v37, %v549_v36  ;;  %v552_v40 = vld [vmem:[%s3430_s5 + $0x18] sm:$0xff]  ;;  %v2842_v41 = vsub.s32 5, %v2797_v19 }
  0x1b   : > { %s381_s29 = scalar_lea.vmem %s3425_s0, %s2356_s22  ;;  %v2441_v42 = vpack.c.bf16 %v552_v40, %v551_v39  ;;  %v2850_v44 = vsub.s32 6, %v2797_v19  ;;  %v2855_v46 = vsub.s32 7, %v2797_v19  ;;  %v2363_v48 = vld [vmem:[%s3433_s8] ss:$0 sm:$0xff]  ;;  %vm2120_vm5 = vcmask 195712   ;;  %s2367_s30 = sshll.u32 %s2716_s21, 7 }
  0x1c   : > { %2430 = vmatpush3.bf16.msra.mxu0 %v2429_v11  ;;  %v2778_v14 = vld [vmem:[%s381_s29] sm:$0xff]  ;;  %vm2127_vm6 = vcmask 261312   ;;  %vm2262_vm7 = vcmask 1041409   ;;  %vm2264_vm8 = vcmask 1042434   ;;  %vm2266_vm9 = vcmask 1043459   ;;  %s3349_s29 = sshll.u32 %s375_s25, 3  ;;  %s3380_s16 = scalar_lea.hbm %s3436_s11, %s2367_s30 }
  0x1d   : > { %2437 = vmatprep.subr.bf16.mxu0 %v2629_v3  ;;  %2436 = vmatpush3.bf16.msra.mxu1 %v2435_v13  ;;  %v2794_v18 = vmul.f32 %v2365_v16, %v2778_v14  ;;  %vm2268_vm10 = vcmask 1044484   ;;  %vm2270_vm11 = vcmask 1045509   ;;  %vm2272_vm12 = vcmask 1046534   ;;  %s377_s12 = scalar_lea.vmem [#allocation4], %s3349_s29  ;;  %s2279_s21 = scalar_lea.sflag [#allocation5], %s375_s25 }
  0x1e   : > { %2420 = vmatprep.subr.mxu1 %v2631_v6  ;;  %s2292_s13 = sshll.u32 %s377_s12, 4  ;;  %vm2274_vm13 = vcmask 1047559   ;;  %s2634_s24 = smov [#allocation4]   ;;  %s3382_s13 = int_to_ptr.vmem [resolvable:$true] %s2292_s13 }
  0x1f   : > { %2396 = vmatmul.mubr.msk.f32.vlgmr.msra.gmra.mrb[0].mxu0 %vm394_vm1, %v2778_v14  ;;  %v1761_v22 = vrot.slane %v2794_v18, %v2800_v20  ;;  %v1780_v23 = vrot.slane %v2794_v18, %v2803_v21  ;;  %v1799_v25 = vrot.slane %v2794_v18, %v2810_v24  ;;  %v1818_v27 = vrot.slane %v2794_v18, %v2815_v26  ;;  %s2565_s22 = scalar_lea.vmem %s3382_s13, 128  ;;  %s2569_s29 = sshll.u32 %s2634_s24, 4  ;;  %s2570_s29 = int_to_ptr.vmem [resolvable:$false] %s2569_s29 }
  0x20   : > { %2417 = vmatprep.mubr.msk.f32.mxu0 %vm2630_vm0, %v2631_v6  ;;  %2407 = vmatmul.mubr.msk.f32.vlgmr.msra.gmra.mrb[0].mxu1 %vm394_vm1, %v2778_v14  ;;  %v1837_v35 = vrot.slane %v2794_v18, %v2825_v34  ;;  %v1856_v43 = vrot.slane %v2794_v18, %v2842_v41  ;;  %v1875_v45 = vrot.slane %v2794_v18, %v2850_v44  ;;  %p2566_p11 = scmp.ne.s32.totalorder %s3382_s13, %s2565_s22  ;;  %s2571_s30 = scalar_lea.vmem %s2570_s29, 256 }
  0x21   : > { %2421 = vmatpush3.msra.mxu1 %v630_v15  ;;  %2422 = vmatprep.mubr.msk.f32.mxu1 %vm2630_vm0, %v2631_v6  ;;  %v1894_v47 = vrot.slane %v2794_v18, %v2855_v46  ;;  %p2572_p0 = scmp.lt.s32.totalorder %s3382_s13, %s2570_s29  ;;  %p2573_p1 = scmp.lt.s32.totalorder %s2571_s30, %s2565_s22 }
  0x22   : > { %1763 = vbcast.lane.b32.xlu1 %v1761_v22, 256  ;;  %1767 = vbcast.lane.b32.xlu0 %v1761_v22, 264  ;;  %p2567_p12 = pnand %p2566_p11, %p2733_p5 }
  0x23   : > { %2439 = vmatpush3.bf16.msra.mxu0 %v2438_v38  ;;  %p2574_p2 = por %p2573_p1, %p2572_p0 }
  0x24   : > { %2440 = vmatprep.subr.bf16.mxu0 %v2629_v3  ;;  %p2568_p13 = pneg %p2567_p12 }
  0x26   : > { %1771 = vbcast.lane.b32.xlu1 %v1761_v22, 272  ;;  %1782 = vbcast.lane.b32.xlu0 %v1780_v23, 256  ;;  %p2575_p3 = pnand %p2574_p2, %p2568_p13 }
  0x27   : > { %2442 = vmatpush3.bf16.msra.mxu0 %v2441_v42 }
  0x2a   : > { %1775 = vbcast.lane.b32.xlu1 %v1761_v22, 280  ;;  %1790 = vbcast.lane.b32.xlu0 %v1780_v23, 272 }
  0x2b   : > { %2418 = vmatmul.mubr.msk.f32.vlgmr.msra.gmra.mrb[2].mxu0 %vm394_vm1, %v2778_v14 }
  0x2e   : > { %1786 = vbcast.lane.b32.xlu1 %v1780_v23, 264  ;;  %1801 = vbcast.lane.b32.xlu0 %v1799_v25, 256 }
  0x32   : > { %1794 = vbcast.lane.b32.xlu1 %v1780_v23, 280  ;;  %1809 = vbcast.lane.b32.xlu0 %v1799_v25, 272 }
  0x36   : > { %1805 = vbcast.lane.b32.xlu1 %v1799_v25, 264  ;;  %1820 = vbcast.lane.b32.xlu0 %v1818_v27, 256 }
  0x3a   : > { %1813 = vbcast.lane.b32.xlu1 %v1799_v25, 280  ;;  %1828 = vbcast.lane.b32.xlu0 %v1818_v27, 272 }
  0x3e   : > { %1824 = vbcast.lane.b32.xlu1 %v1818_v27, 264  ;;  %1839 = vbcast.lane.b32.xlu0 %v1837_v35, 256 }
  0x42   : > { %1832 = vbcast.lane.b32.xlu1 %v1818_v27, 280  ;;  %1847 = vbcast.lane.b32.xlu0 %v1837_v35, 272  ;;  %v2632_v27 = vmov 1966171168  }
  0x46   : > { %1843 = vbcast.lane.b32.xlu1 %v1837_v35, 264  ;;  %1858 = vbcast.lane.b32.xlu0 %v1856_v43, 256 }
  0x4a   : > { %1851 = vbcast.lane.b32.xlu1 %v1837_v35, 280  ;;  %1866 = vbcast.lane.b32.xlu0 %v1856_v43, 272 }
  0x4e   : > { %1862 = vbcast.lane.b32.xlu1 %v1856_v43, 264  ;;  %1877 = vbcast.lane.b32.xlu0 %v1875_v45, 256 }
  0x52   : > { %1870 = vbcast.lane.b32.xlu1 %v1856_v43, 280  ;;  %1885 = vbcast.lane.b32.xlu0 %v1875_v45, 272 }
  0x56   : > { %1881 = vbcast.lane.b32.xlu1 %v1875_v45, 264  ;;  %1896 = vbcast.lane.b32.xlu0 %v1894_v47, 256 }
  0x5a   : > { %1889 = vbcast.lane.b32.xlu1 %v1875_v45, 280  ;;  %1904 = vbcast.lane.b32.xlu0 %v1894_v47, 272 }
  0x5e   : > { %1900 = vbcast.lane.b32.xlu1 %v1894_v47, 264 }
  0x62   : > { %1908 = vbcast.lane.b32.xlu1 %v1894_v47, 280 }
  0x94   : > { %v2864_v63 = vpop.permute.xlu1 %1763  ;;  %v2870_v3 = vpop.permute.xlu0 %1767 }
  0x98   : > { %v2867_v1 = vpop.permute.xlu1 %1771  ;;  %v2875_v6 = vpop.permute.xlu0 %1782 }
  0x9c   : > { %v2872_v4 = vpop.permute.xlu1 %1775  ;;  %v2879_v8 = vpop.permute.xlu0 %1790 }
  0xa0   : > { %v2877_v7 = vpop.permute.xlu1 %1786  ;;  %v2884_v11 = vpop.permute.xlu0 %1801 }
  0xa4   : > { %v2881_v9 = vpop.permute.xlu1 %1794  ;;  %v2889_v15 = vpop.permute.xlu0 %1809 }
  0xa8   : > { %v2886_v12 = vpop.permute.xlu1 %1805  ;;  %v2894_v22 = vpop.permute.xlu0 %1820 }
  0xac   : > { %v2891_v16 = vpop.permute.xlu1 %1813 }
  0xb0   : > { %v2896_v23 = vpop.permute.xlu1 %1824 }
  0xf2   : > { %v464_v29 = vpop.f32.mrb[0].mxu0 }
  0xf3   : > { %v465_v30 = vadd.f32 %v2357_v28, %v464_v29  ;;  %v2397_v31 = vpop.f32.mrb[1].mxu0  ;;  %v2822_v32 = vpop.f32.mrb[0].mxu1  ;;  %v1174_v28 = vunpack.c.l.s4 %v2632_v27 }
  0xf4   : > { %v2408_v33 = vpop.f32.mrb[1].mxu1  ;;  %v2901_v29 = vpop.permute.xlu0 %1828 }
  0xf5   : > { %2423 = vmatmul.mubr.msk.f32.vlgmr.msra.gmra.mrb[2].mxu1 %vm638_vm2, %v465_v30  ;;  %v2903_v30 = vpop.permute.xlu1 %1832  ;;  %v1175_v33 = vunpack.c.0.s8 %v1174_v28 }
  0xf7   : > { %v2917_v40 = vsub.s32 %v1175_v33, %v2797_v19 }
  0xf8   : > { %v2910_v37 = vpop.permute.xlu0 %1839 }
  0xf9   : > { %v2912_v38 = vpop.permute.xlu1 %1843 }
  0xfc   : > { %v2926_v47 = vpop.permute.xlu0 %1847 }
  0xfe   : > { %v626_v35 = vpop.f32.mrb[2].mxu0 }
  0xff   : > { %v2419_v36 = vpop.f32.mrb[3].mxu0 }
 0x1c8   : > { %v708_v49 = vpop.f32.mrb[2].mxu1 }
 0x1c9   : > { %v709_v50 = vadd.f32 %v2363_v48, %v708_v49  ;;  %v2424_v51 = vpop.f32.mrb[3].mxu1  ;;  %v2928_v48 = vpop.permute.xlu1 %1851 }
 0x1ca   : > { %v2937_v51 = vpop.permute.xlu0 %1858 }
 0x1cb   : > { %v713_v52 = vand.u32 2147483647, %v709_v50  ;;  %v712_v58 = vmax.f32 %v709_v50, 0.0 }
 0x1cd   : > { %v714_v53 = vsub.f32 0.0, %v713_v52  ;;  %v2939_v52 = vpop.permute.xlu1 %1862 }
 0x1cf   : > { %v715_v54 = vmul.f32 1.442695, %v714_v53  ;;  %v2941_v53 = vpop.permute.xlu0 %1866 }
 0x1d1   : > { %2489 = vpow2.f32 %v715_v54  ;;  %v2943_v54 = vpop.permute.xlu1 %1870 }
 0x1db   : > { %v2490_v55 = vpop.eup %2489 }
 0x1dc   : > { %v717_v56 = vadd.f32 1.0, %v2490_v55 }
 0x1de   : > { %2491 = vlog2.f32 %v717_v56  ;;  %v2947_v56 = vpop.permute.xlu0 %1877 }
 0x1e8   : > { %v2492_v57 = vpop.eup %2491 }
 0x1e9   : > { %v719_v59 = vmul.f32 0.6931472, %v2492_v57  ;;  %v723_v57 = vld [vmem:[%s3434_s9 + $0x10] sm:$0xff] }
 0x1eb   : > { %v720_v60 = vadd.f32 %v719_v59, %v712_v58  ;;  %v721_v58 = vld [vmem:[%s3434_s9] sm:$0xff]  ;;  %v729_v59 = vmul.f32 1.442695, %v723_v57 }
 0x1ed   : > { %v740_v61 = vrot.slane %v720_v60, %v2800_v20  ;;  %v759_v62 = vrot.slane %v720_v60, %v2803_v21  ;;  %v778_v0 = vrot.slane %v720_v60, %v2810_v24  ;;  %v797_v2 = vrot.slane %v720_v60, %v2815_v26 }
 0x1ee   : > { %v816_v5 = vrot.slane %v720_v60, %v2825_v34  ;;  %v835_v10 = vrot.slane %v720_v60, %v2842_v41  ;;  %v854_v13 = vrot.slane %v720_v60, %v2850_v44  ;;  %v873_v18 = vrot.slane %v720_v60, %v2855_v46 }
 0x1ef   : > { %750 = vbcast.lane.b32.xlu1 %v740_v61, 272  ;;  %742 = vbcast.lane.b32.xlu0 %v740_v61, 256  ;;  %v2899_v25 = vmul.f32 %v720_v60, %v2778_v14  ;;  %v2361_v14 = vld [vmem:[%s3431_s6] ss:$0 sm:$0xff]  ;;  %v725_v60 = vmul.f32 1.442695, %v721_v58  ;;  %2493 = vpow2.f32 %v729_v59 }
 0x1f0   : > { %v2914_v39 = vadd.f32 %v2361_v14, %v626_v35 }
 0x1f1   : > { %v1022_v31 = vrot.slane %v2899_v25, %v2800_v20  ;;  %v1041_v43 = vrot.slane %v2899_v25, %v2803_v21  ;;  %v1060_v21 = vrot.slane %v2899_v25, %v2810_v24  ;;  %v1079_v55 = vrot.slane %v2899_v25, %v2815_v26  ;;  %v2949_v24 = vpop.permute.xlu1 %1881 }
 0x1f2   : > { %v1532_v42 = vcombine.high %v2914_v39, %v2914_v39  ;;  %v1098_v26 = vrot.slane %v2899_v25, %v2825_v34  ;;  %2495 = vpow2.f32 %v725_v60  ;;  %v1117_v34 = vrot.slane %v2899_v25, %v2842_v41 }
 0x1f3   : > { %754 = vbcast.lane.b32.xlu1 %v740_v61, 280  ;;  %746 = vbcast.lane.b32.xlu0 %v740_v61, 264  ;;  %v724_v61 = vld [vmem:[%s3434_s9 + $0x18] sm:$0xff]  ;;  %v1136_v35 = vrot.slane %v2899_v25, %v2850_v44 }
 0x1f4   : > { %v2924_v45 = vrot.slane %v1532_v42, %v2917_v40 }
 0x1f6   : > { %v1548_v49 = vcombine.high %v2924_v45, %v2924_v45 }
 0x1f7   : > { %765 = vbcast.lane.b32.xlu1 %v759_v62, 264  ;;  %761 = vbcast.lane.b32.xlu0 %v759_v62, 256 }
 0x1f8   : > { %v2933_v50 = vrot.slane %v1548_v49, %v2917_v40 }
 0x1f9   : > { %v2494_v27 = vpop.eup %2493 }
 0x1fa   : > { %v2981_v41 = vsub.f32 0.0, %v2494_v27 }
 0x1fb   : > { %773 = vbcast.lane.b32.xlu1 %v759_v62, 280  ;;  %769 = vbcast.lane.b32.xlu0 %v759_v62, 272  ;;  %v722_v62 = vld [vmem:[%s3434_s9 + $0x8] sm:$0xff] }
 0x1fc   : > { %v2496_v28 = vpop.eup %2495 }
 0x1fd   : > { %v2983_v36 = vsub.f32 0.0, %v2496_v28 }
 0x1ff   : > { %784 = vbcast.lane.b32.xlu1 %v778_v0, 264  ;;  %780 = vbcast.lane.b32.xlu0 %v778_v0, 256 }
 0x203   : > { %792 = vbcast.lane.b32.xlu1 %v778_v0, 280  ;;  %788 = vbcast.lane.b32.xlu0 %v778_v0, 272  ;;  %v2965_v0 = vpop.permute.xlu0 %1885 }
 0x207   : > { %803 = vbcast.lane.b32.xlu1 %v797_v2, 264  ;;  %799 = vbcast.lane.b32.xlu0 %v797_v2, 256 }
 0x20b   : > { %811 = vbcast.lane.b32.xlu1 %v797_v2, 280  ;;  %807 = vbcast.lane.b32.xlu0 %v797_v2, 272  ;;  %v2967_v2 = vpop.permute.xlu1 %1889 }
 0x20f   : > { %822 = vbcast.lane.b32.xlu1 %v816_v5, 264  ;;  %818 = vbcast.lane.b32.xlu0 %v816_v5, 256 }
 0x213   : > { %830 = vbcast.lane.b32.xlu1 %v816_v5, 280  ;;  %826 = vbcast.lane.b32.xlu0 %v816_v5, 272  ;;  %v731_v5 = vmul.f32 1.442695, %v724_v61  ;;  %v1155_v61 = vrot.slane %v2899_v25, %v2855_v46 }
 0x215   : > { %2497 = vpow2.f32 %v731_v5 }
 0x217   : > { %841 = vbcast.lane.b32.xlu1 %v835_v10, 264  ;;  %837 = vbcast.lane.b32.xlu0 %v835_v10, 256 }
 0x21b   : > { %849 = vbcast.lane.b32.xlu1 %v835_v10, 280  ;;  %845 = vbcast.lane.b32.xlu0 %v835_v10, 272  ;;  %v727_v10 = vmul.f32 1.442695, %v722_v62 }
 0x21d   : > { %2499 = vpow2.f32 %v727_v10 }
 0x21f   : > { %860 = vbcast.lane.b32.xlu1 %v854_v13, 264  ;;  %856 = vbcast.lane.b32.xlu0 %v854_v13, 256  ;;  %v2498_v14 = vpop.eup %2497 }
 0x220   : > { %v2987_v57 = vsub.f32 0.0, %v2498_v14 }
 0x223   : > { %868 = vbcast.lane.b32.xlu1 %v854_v13, 280  ;;  %864 = vbcast.lane.b32.xlu0 %v854_v13, 272  ;;  %v2971_v13 = vpop.permute.xlu0 %1896 }
 0x227   : > { %879 = vbcast.lane.b32.xlu1 %v873_v18, 264  ;;  %875 = vbcast.lane.b32.xlu0 %v873_v18, 256  ;;  %v2500_v42 = vpop.eup %2499 }
 0x228   : > { %v2989_v58 = vsub.f32 0.0, %v2500_v42 }
 0x22b   : > { %887 = vbcast.lane.b32.xlu1 %v873_v18, 280  ;;  %883 = vbcast.lane.b32.xlu0 %v873_v18, 272  ;;  %v2973_v18 = vpop.permute.xlu1 %1900 }
 0x22f   : > { %1028 = vbcast.lane.b32.xlu1 %v1022_v31, 264  ;;  %1024 = vbcast.lane.b32.xlu0 %v1022_v31, 256  ;;  %v2977_v33 = vpop.permute.xlu1 %1908 }
 0x230   : > { %3444 = vst [vmem:[#allocation9_spill] sm:$0xff] %v2977_v33 }
 0x233   : > { %1036 = vbcast.lane.b32.xlu1 %v1022_v31, 280  ;;  %1032 = vbcast.lane.b32.xlu0 %v1022_v31, 272  ;;  %v2975_v31 = vpop.permute.xlu0 %1904 }
 0x234   : > { %3443 = vst [vmem:[#allocation8_spill] sm:$0xff] %v2975_v31 }
 0x237   : > { %1047 = vbcast.lane.b32.xlu1 %v1041_v43, 264  ;;  %1043 = vbcast.lane.b32.xlu0 %v1041_v43, 256 }
 0x23b   : > { %1055 = vbcast.lane.b32.xlu1 %v1041_v43, 280  ;;  %1051 = vbcast.lane.b32.xlu0 %v1041_v43, 272 }
 0x23f   : > { %1066 = vbcast.lane.b32.xlu1 %v1060_v21, 264  ;;  %1062 = vbcast.lane.b32.xlu0 %v1060_v21, 256 }
 0x243   : > { %1074 = vbcast.lane.b32.xlu1 %v1060_v21, 280  ;;  %1070 = vbcast.lane.b32.xlu0 %v1060_v21, 272 }
 0x247   : > { %1085 = vbcast.lane.b32.xlu1 %v1079_v55, 264  ;;  %1081 = vbcast.lane.b32.xlu0 %v1079_v55, 256 }
 0x24b   : > { %1093 = vbcast.lane.b32.xlu1 %v1079_v55, 280  ;;  %1089 = vbcast.lane.b32.xlu0 %v1079_v55, 272 }
 0x24f   : > { %1104 = vbcast.lane.b32.xlu1 %v1098_v26, 264  ;;  %1100 = vbcast.lane.b32.xlu0 %v1098_v26, 256 }
 0x253   : > { %1112 = vbcast.lane.b32.xlu1 %v1098_v26, 280  ;;  %1108 = vbcast.lane.b32.xlu0 %v1098_v26, 272 }
 0x257   : > { %1123 = vbcast.lane.b32.xlu1 %v1117_v34, 264  ;;  %1119 = vbcast.lane.b32.xlu0 %v1117_v34, 256 }
 0x25b   : > { %1131 = vbcast.lane.b32.xlu1 %v1117_v34, 280  ;;  %1127 = vbcast.lane.b32.xlu0 %v1117_v34, 272 }
 0x25f   : > { %1142 = vbcast.lane.b32.xlu1 %v1136_v35, 264  ;;  %1138 = vbcast.lane.b32.xlu0 %v1136_v35, 256 }
 0x261   : > { %v751_v43 = vpop.permute.xlu1 %750  ;;  %v743_v49 = vpop.permute.xlu0 %742 }
 0x262   : > { %v891_v21 = vmul.f32 %v751_v43, %v2981_v41  ;;  %v889_v55 = vmul.f32 %v743_v49, %v2983_v36 }
 0x263   : > { %1150 = vbcast.lane.b32.xlu1 %v1136_v35, 280  ;;  %1146 = vbcast.lane.b32.xlu0 %v1136_v35, 272 }
 0x264   : > { %v925_v44 = vmul.f32 1.442695, %v891_v21  ;;  %v921_v59 = vmul.f32 1.442695, %v889_v55 }
 0x265   : > { %v755_v26 = vpop.permute.xlu1 %754  ;;  %v747_v60 = vpop.permute.xlu0 %746 }
 0x266   : > { %2501 = vpow2.f32 %v925_v44  ;;  %v892_v62 = vmul.f32 %v755_v26, %v2987_v57  ;;  %v890_v5 = vmul.f32 %v747_v60, %v2989_v58 }
 0x267   : > { %2503 = vpow2.f32 %v921_v59  ;;  %1161 = vbcast.lane.b32.xlu1 %v1155_v61, 264  ;;  %1157 = vbcast.lane.b32.xlu0 %v1155_v61, 256 }
 0x268   : > { %v927_v10 = vmul.f32 1.442695, %v892_v62  ;;  %v923_v34 = vmul.f32 1.442695, %v890_v5 }
 0x269   : > { %v766_v27 = vpop.permute.xlu1 %765  ;;  %v762_v28 = vpop.permute.xlu0 %761 }
 0x26a   : > { %2505 = vpow2.f32 %v927_v10  ;;  %v894_v35 = vmul.f32 %v766_v27, %v2989_v58  ;;  %v893_v14 = vmul.f32 %v762_v28, %v2983_v36 }
 0x26b   : > { %2507 = vpow2.f32 %v923_v34  ;;  %1169 = vbcast.lane.b32.xlu1 %v1155_v61, 280  ;;  %1165 = vbcast.lane.b32.xlu0 %v1155_v61, 272 }
 0x26c   : > { %v931_v46 = vmul.f32 1.442695, %v894_v35  ;;  %v929_v25 = vmul.f32 1.442695, %v893_v14 }
 0x26d   : > { %v774_v42 = vpop.permute.xlu1 %773  ;;  %v770_v43 = vpop.permute.xlu0 %769 }
 0x26e   : > { %2509 = vpow2.f32 %v931_v46  ;;  %v896_v49 = vmul.f32 %v774_v42, %v2987_v57  ;;  %v895_v21 = vmul.f32 %v770_v43, %v2981_v41 }
 0x26f   : > { %2511 = vpow2.f32 %v929_v25 }
 0x270   : > { %v2502_v55 = vpop.eup %2501  ;;  %v935_v44 = vmul.f32 1.442695, %v896_v49  ;;  %v933_v59 = vmul.f32 1.442695, %v895_v21 }
 0x271   : > { %v2504_v26 = vpop.eup %2503  ;;  %988 = vst.msk [vmem:[#allocation2 + $0x10] sm:$0xff] %vm985_vm3, %v2502_v55  ;;  %v785_v60 = vpop.permute.xlu1 %784 }
 0x272   : > { %v781_v62 = vpop.permute.xlu0 %780  ;;  %986 = vst.msk [vmem:[#allocation2] sm:$0xff] %vm985_vm3, %v2504_v26  ;;  %2513 = vpow2.f32 %v935_v44  ;;  %v898_v61 = vmul.f32 %v785_v60, %v2989_v58 }
 0x273   : > { %v897_v5 = vmul.f32 %v781_v62, %v2983_v36  ;;  %2515 = vpow2.f32 %v933_v59 }
 0x274   : > { %v2506_v10 = vpop.eup %2505  ;;  %v939_v34 = vmul.f32 1.442695, %v898_v61 }
 0x275   : > { %v937_v27 = vmul.f32 1.442695, %v897_v5  ;;  %v2508_v28 = vpop.eup %2507  ;;  %989 = vst.msk [vmem:[#allocation2 + $0x18] sm:$0xff] %vm985_vm3, %v2506_v10  ;;  %v793_v35 = vpop.permute.xlu1 %792 }
 0x276   : > { %v789_v14 = vpop.permute.xlu0 %788  ;;  %987 = vst.msk [vmem:[#allocation2 + $0x8] sm:$0xff] %vm985_vm3, %v2508_v28  ;;  %2517 = vpow2.f32 %v939_v34  ;;  %v900_v46 = vmul.f32 %v793_v35, %v2987_v57 }
 0x277   : > { %v899_v25 = vmul.f32 %v789_v14, %v2981_v41  ;;  %2519 = vpow2.f32 %v937_v27 }
 0x278   : > { %v2510_v42 = vpop.eup %2509  ;;  %v943_v43 = vmul.f32 1.442695, %v900_v46 }
 0x279   : > { %v941_v49 = vmul.f32 1.442695, %v899_v25  ;;  %v2512_v21 = vpop.eup %2511  ;;  %991 = vst.msk [vmem:[#allocation2 + $0x28] sm:$0xff] %vm985_vm3, %v2510_v42  ;;  %v804_v55 = vpop.permute.xlu1 %803 }
 0x27a   : > { %v800_v44 = vpop.permute.xlu0 %799  ;;  %990 = vst.msk [vmem:[#allocation2 + $0x20] sm:$0xff] %vm985_vm3, %v2512_v21  ;;  %2521 = vpow2.f32 %v943_v43  ;;  %v902_v59 = vmul.f32 %v804_v55, %v2989_v58 }
 0x27b   : > { %v901_v26 = vmul.f32 %v800_v44, %v2983_v36  ;;  %2523 = vpow2.f32 %v941_v49 }
 0x27c   : > { %v2514_v60 = vpop.eup %2513  ;;  %v947_v62 = vmul.f32 1.442695, %v902_v59 }
 0x27d   : > { %v945_v61 = vmul.f32 1.442695, %v901_v26  ;;  %v2516_v5 = vpop.eup %2515  ;;  %993 = vst.msk [vmem:[#allocation2 + $0x38] sm:$0xff] %vm985_vm3, %v2514_v60  ;;  %v812_v10 = vpop.permute.xlu1 %811 }
 0x27e   : > { %v808_v34 = vpop.permute.xlu0 %807  ;;  %992 = vst.msk [vmem:[#allocation2 + $0x30] sm:$0xff] %vm985_vm3, %v2516_v5  ;;  %2525 = vpow2.f32 %v947_v62  ;;  %v904_v27 = vmul.f32 %v812_v10, %v2987_v57 }
 0x27f   : > { %v903_v28 = vmul.f32 %v808_v34, %v2981_v41  ;;  %2527 = vpow2.f32 %v945_v61 }
 0x280   : > { %v2518_v35 = vpop.eup %2517  ;;  %v951_v14 = vmul.f32 1.442695, %v904_v27 }
 0x281   : > { %v949_v46 = vmul.f32 1.442695, %v903_v28  ;;  %v2520_v25 = vpop.eup %2519  ;;  %995 = vst.msk [vmem:[#allocation2 + $0x48] sm:$0xff] %vm985_vm3, %v2518_v35  ;;  %v823_v42 = vpop.permute.xlu1 %822 }
 0x282   : > { %v819_v43 = vpop.permute.xlu0 %818  ;;  %994 = vst.msk [vmem:[#allocation2 + $0x40] sm:$0xff] %vm985_vm3, %v2520_v25  ;;  %2529 = vpow2.f32 %v951_v14  ;;  %v906_v49 = vmul.f32 %v823_v42, %v2989_v58 }
 0x283   : > { %v905_v21 = vmul.f32 %v819_v43, %v2983_v36  ;;  %2531 = vpow2.f32 %v949_v46 }
 0x284   : > { %v2522_v55 = vpop.eup %2521  ;;  %v955_v44 = vmul.f32 1.442695, %v906_v49 }
 0x285   : > { %v953_v59 = vmul.f32 1.442695, %v905_v21  ;;  %v2524_v26 = vpop.eup %2523  ;;  %997 = vst.msk [vmem:[#allocation2 + $0x58] sm:$0xff] %vm985_vm3, %v2522_v55  ;;  %v831_v60 = vpop.permute.xlu1 %830 }
 0x286   : > { %v827_v62 = vpop.permute.xlu0 %826  ;;  %996 = vst.msk [vmem:[#allocation2 + $0x50] sm:$0xff] %vm985_vm3, %v2524_v26  ;;  %2533 = vpow2.f32 %v955_v44  ;;  %v908_v61 = vmul.f32 %v831_v60, %v2987_v57 }
 0x287   : > { %v907_v5 = vmul.f32 %v827_v62, %v2981_v41  ;;  %2535 = vpow2.f32 %v953_v59 }
 0x288   : > { %v2526_v10 = vpop.eup %2525  ;;  %v959_v34 = vmul.f32 1.442695, %v908_v61 }
 0x289   : > { %v957_v27 = vmul.f32 1.442695, %v907_v5  ;;  %v2528_v28 = vpop.eup %2527  ;;  %999 = vst.msk [vmem:[#allocation2 + $0x68] sm:$0xff] %vm985_vm3, %v2526_v10  ;;  %v842_v35 = vpop.permute.xlu1 %841  ;;  %v2359_v10 = vld [vmem:[%s3429_s4] ss:$0 sm:$0xff] }
 0x28a   : > { %v838_v14 = vpop.permute.xlu0 %837  ;;  %998 = vst.msk [vmem:[#allocation2 + $0x60] sm:$0xff] %vm985_vm3, %v2528_v28  ;;  %2537 = vpow2.f32 %v959_v34  ;;  %v910_v46 = vmul.f32 %v842_v35, %v2989_v58 }
 0x28b   : > { %v909_v25 = vmul.f32 %v838_v14, %v2983_v36  ;;  %2539 = vpow2.f32 %v957_v27 }
 0x28c   : > { %v2530_v42 = vpop.eup %2529  ;;  %v963_v43 = vmul.f32 1.442695, %v910_v46  ;;  %v3039_v46 = vadd.f32 %v2359_v10, %v2822_v32 }
 0x28d   : > { %v961_v49 = vmul.f32 1.442695, %v909_v25  ;;  %v2532_v21 = vpop.eup %2531  ;;  %1001 = vst.msk [vmem:[#allocation2 + $0x78] sm:$0xff] %vm985_vm3, %v2530_v42  ;;  %v850_v55 = vpop.permute.xlu1 %849 }
 0x28e   : > { %v846_v44 = vpop.permute.xlu0 %845  ;;  %1000 = vst.msk [vmem:[#allocation2 + $0x70] sm:$0xff] %vm985_vm3, %v2532_v21  ;;  %2541 = vpow2.f32 %v963_v43  ;;  %v912_v59 = vmul.f32 %v850_v55, %v2987_v57  ;;  %v1179_v32 = vrot.slane %v3039_v46, %v2917_v40 }
 0x28f   : > { %v911_v26 = vmul.f32 %v846_v44, %v2981_v41  ;;  %2543 = vpow2.f32 %v961_v49 }
 0x290   : > { %v2534_v60 = vpop.eup %2533  ;;  %v967_v62 = vmul.f32 1.442695, %v912_v59 }
 0x291   : > { %v965_v61 = vmul.f32 1.442695, %v911_v26  ;;  %v2536_v5 = vpop.eup %2535  ;;  %1003 = vst.msk [vmem:[#allocation2 + $0x88] sm:$0xff] %vm985_vm3, %v2534_v60  ;;  %v861_v34 = vpop.permute.xlu1 %860 }
 0x292   : > { %v857_v27 = vpop.permute.xlu0 %856  ;;  %1002 = vst.msk [vmem:[#allocation2 + $0x80] sm:$0xff] %vm985_vm3, %v2536_v5  ;;  %2545 = vpow2.f32 %v967_v62  ;;  %v914_v28 = vmul.f32 %v861_v34, %v2989_v58 }
 0x293   : > { %v913_v35 = vmul.f32 %v857_v27, %v2983_v36  ;;  %2547 = vpow2.f32 %v965_v61 }
 0x294   : > { %v2538_v14 = vpop.eup %2537  ;;  %v971_v25 = vmul.f32 1.442695, %v914_v28  ;;  %v3052_v28 = vrot.slane %v1179_v32, %v2917_v40 }
 0x295   : > { %v969_v42 = vmul.f32 1.442695, %v913_v35  ;;  %v2540_v43 = vpop.eup %2539  ;;  %1005 = vst.msk [vmem:[#allocation2 + $0x98] sm:$0xff] %vm985_vm3, %v2538_v14  ;;  %v869_v49 = vpop.permute.xlu1 %868 }
 0x296   : > { %v865_v21 = vpop.permute.xlu0 %864  ;;  %1004 = vst.msk [vmem:[#allocation2 + $0x90] sm:$0xff] %vm985_vm3, %v2540_v43  ;;  %2549 = vpow2.f32 %v971_v25  ;;  %v916_v55 = vmul.f32 %v869_v49, %v2987_v57 }
 0x297   : > { %v915_v44 = vmul.f32 %v865_v21, %v2981_v41  ;;  %2551 = vpow2.f32 %v969_v42  ;;  %v1187_v21 = vcombine.high %v1179_v32, %v1179_v32 }
 0x298   : > { %v2542_v59 = vpop.eup %2541  ;;  %v975_v26 = vmul.f32 1.442695, %v916_v55  ;;  %v1224_v55 = vrot.slane %v3052_v28, %v2800_v20 }
 0x299   : > { %v973_v60 = vmul.f32 1.442695, %v915_v44  ;;  %v2544_v62 = vpop.eup %2543  ;;  %1007 = vst.msk [vmem:[#allocation2 + $0xa8] sm:$0xff] %vm985_vm3, %v2542_v59  ;;  %v880_v61 = vpop.permute.xlu1 %879 }
 0x29a   : > { %v876_v5 = vpop.permute.xlu0 %875  ;;  %1006 = vst.msk [vmem:[#allocation2 + $0xa0] sm:$0xff] %vm985_vm3, %v2544_v62  ;;  %2553 = vpow2.f32 %v975_v26  ;;  %v918_v10 = vmul.f32 %v880_v61, %v2989_v58 }
 0x29b   : > { %v917_v34 = vmul.f32 %v876_v5, %v2983_v36  ;;  %2555 = vpow2.f32 %v973_v60  ;;  %v3063_v5 = vrot.slane %v1187_v21, %v2917_v40 }
 0x29c   : > { %v2546_v27 = vpop.eup %2545  ;;  %v979_v35 = vmul.f32 1.442695, %v918_v10 }
 0x29d   : > { %v977_v14 = vmul.f32 1.442695, %v917_v34  ;;  %v2548_v25 = vpop.eup %2547  ;;  %1009 = vst.msk [vmem:[#allocation2 + $0xb8] sm:$0xff] %vm985_vm3, %v2546_v27  ;;  %v888_v42 = vpop.permute.xlu1 %887 }
 0x29e   : > { %v884_v43 = vpop.permute.xlu0 %883  ;;  %1008 = vst.msk [vmem:[#allocation2 + $0xb0] sm:$0xff] %vm985_vm3, %v2548_v25  ;;  %2557 = vpow2.f32 %v979_v35  ;;  %v920_v49 = vmul.f32 %v888_v42, %v2987_v57  ;;  %v1325_v25 = vld [vmem:[#allocation2] sm:$0xff] }
 0x29f   : > { %v919_v58 = vmul.f32 %v884_v43, %v2981_v41  ;;  %2559 = vpow2.f32 %v977_v14  ;;  %v1326_v14 = vld [vmem:[#allocation2 + $0x8] sm:$0xff]  ;;  %v1228_v43 = vrot.slane %v3063_v5, %v2800_v20 }
 0x2a0   : > { %v2550_v36 = vpop.eup %2549  ;;  %v983_v44 = vmul.f32 1.442695, %v920_v49  ;;  %v1330_v21 = vmul.f32 0.0, %v1326_v14 }
 0x2a1   : > { %v981_v59 = vmul.f32 1.442695, %v919_v58  ;;  %v2552_v26 = vpop.eup %2551  ;;  %1011 = vst.msk [vmem:[#allocation2 + $0xc8] sm:$0xff] %vm985_vm3, %v2550_v36  ;;  %v1029_v60 = vpop.permute.xlu1 %1028 }
 0x2a2   : > { %v1025_v62 = vpop.permute.xlu0 %1024  ;;  %1010 = vst.msk [vmem:[#allocation2 + $0xc0] sm:$0xff] %vm985_vm3, %v2552_v26  ;;  %2561 = vpow2.f32 %v983_v44  ;;  %v1262_v61 = vmul.f32 %v1224_v55, %v1029_v60  ;;  %v1329_v44 = vmul.f32 0.0, %v1325_v25 }
 0x2a3   : > { %v1261_v57 = vmul.f32 %v1224_v55, %v1025_v62  ;;  %2563 = vpow2.f32 %v981_v59 }
 0x2a4   : > { %v2554_v41 = vpop.eup %2553  ;;  %1294 = vst.msk [vmem:[#allocation3 + $0x8] sm:$0xff] %vm985_vm3, %v1262_v61  ;;  %v1328_v61 = vld [vmem:[#allocation2 + $0x18] sm:$0xff] }
 0x2a5   : > { %1293 = vst.msk [vmem:[#allocation3] sm:$0xff] %vm985_vm3, %v1261_v57  ;;  %v2556_v32 = vpop.eup %2555  ;;  %1013 = vst.msk [vmem:[#allocation2 + $0xd8] sm:$0xff] %vm985_vm3, %v2554_v41  ;;  %v1037_v10 = vpop.permute.xlu1 %1036  ;;  %v3077_v57 = vrot.slane %v2914_v39, %v2917_v40  ;;  %v1332_v39 = vmul.f32 0.0, %v1328_v61 }
 0x2a6   : > { %v1033_v34 = vpop.permute.xlu0 %1032  ;;  %1012 = vst.msk [vmem:[#allocation2 + $0xd0] sm:$0xff] %vm985_vm3, %v2556_v32  ;;  %v1264_v27 = vmul.f32 %v1224_v55, %v1037_v10  ;;  %v1217_v32 = vcombine.high %v3052_v28, %v3052_v28 }
 0x2a7   : > { %v1263_v35 = vmul.f32 %v1224_v55, %v1033_v34  ;;  %v1327_v55 = vld [vmem:[#allocation2 + $0x10] sm:$0xff] }
 0x2a8   : > { %v2558_v42 = vpop.eup %2557  ;;  %1296 = vst.msk [vmem:[#allocation3 + $0x18] sm:$0xff] %vm985_vm3, %v1264_v27  ;;  %v1331_v25 = vmul.f32 0.0, %v1327_v55 }
 0x2a9   : > { %1295 = vst.msk [vmem:[#allocation3 + $0x10] sm:$0xff] %vm985_vm3, %v1263_v35  ;;  %v2560_v49 = vpop.eup %2559  ;;  %1015 = vst.msk [vmem:[#allocation2 + $0xe8] sm:$0xff] %vm985_vm3, %v2558_v42  ;;  %v1048_v58 = vpop.permute.xlu1 %1047 }
 0x2aa   : > { %v1044_v36 = vpop.permute.xlu0 %1043  ;;  %1014 = vst.msk [vmem:[#allocation2 + $0xe0] sm:$0xff] %vm985_vm3, %v2560_v49  ;;  %v1266_v59 = vmul.f32 %v1228_v43, %v1048_v58 }
 0x2ab   : > { %v1265_v26 = vmul.f32 %v1228_v43, %v1044_v36  ;;  %v1334_v60 = vld [vmem:[#allocation3 + $0x8] sm:$0xff]  ;;  %v3089_v36 = vrot.slane %v3077_v57, %v2917_v40 }
 0x2ac   : > { %v1333_v62 = vld [vmem:[#allocation3] sm:$0xff]  ;;  %v2562_v41 = vpop.eup %2561  ;;  %v1338_v10 = vadd.f32 %v1334_v60, %v1330_v21  ;;  %1298 = vst.msk [vmem:[#allocation3 + $0x28] sm:$0xff] %vm985_vm3, %v1266_v59  ;;  %v1232_v59 = vrot.slane %v1217_v32, %v2800_v20  ;;  %v1172_v32 = vcombine.high %v3039_v46, %v3039_v46 }
 0x2ad   : > { %v1337_v34 = vadd.f32 %v1333_v62, %v1329_v44  ;;  %1297 = vst.msk [vmem:[#allocation3 + $0x20] sm:$0xff] %vm985_vm3, %v1265_v26  ;;  %v2564_v27 = vpop.eup %2563  ;;  %1017 = vst.msk [vmem:[#allocation2 + $0xf8] sm:$0xff] %vm985_vm3, %v2562_v41  ;;  %v1056_v35 = vpop.permute.xlu1 %1055  ;;  %v1347_v26 = vld [vmem:[#allocation2 + $0x28] sm:$0xff]  ;;  %v1346_v60 = vld [vmem:[#allocation2 + $0x20] sm:$0xff] }
 0x2ae   : > { %v1052_v14 = vpop.permute.xlu0 %1051  ;;  %1016 = vst.msk [vmem:[#allocation2 + $0xf0] sm:$0xff] %vm985_vm3, %v2564_v27  ;;  %1342 = vst.msk [vmem:[#allocation3 + $0x8] sm:$0xff] %vm985_vm3, %v1338_v10  ;;  %v1268_v28 = vmul.f32 %v1228_v43, %v1056_v35 }
 0x2af   : > { %1341 = vst.msk [vmem:[#allocation3] sm:$0xff] %vm985_vm3, %v1337_v34  ;;  %v1267_v42 = vmul.f32 %v1228_v43, %v1052_v14  ;;  %v1336_v49 = vld [vmem:[#allocation3 + $0x18] sm:$0xff]  ;;  %v1351_v43 = vmul.f32 %v1347_v26, %v1338_v10  ;;  %v1350_v61 = vmul.f32 %v1346_v60, %v1337_v34  ;;  %v1547_v10 = vcombine.high %v3077_v57, %v3077_v57  ;;  %v1348_v34 = vld [vmem:[#allocation2 + $0x30] sm:$0xff] }
 0x2b0   : > { %v1335_v58 = vld [vmem:[#allocation3 + $0x10] sm:$0xff]  ;;  %v1340_v21 = vadd.f32 %v1336_v49, %v1332_v39  ;;  %1300 = vst.msk [vmem:[#allocation3 + $0x38] sm:$0xff] %vm985_vm3, %v1268_v28  ;;  %v1584_v39 = vrot.slane %v3089_v36, %v2800_v20  ;;  %v1349_v49 = vld [vmem:[#allocation2 + $0x38] sm:$0xff] }
 0x2b1   : > { %v1339_v44 = vadd.f32 %v1335_v58, %v1331_v25  ;;  %1299 = vst.msk [vmem:[#allocation3 + $0x30] sm:$0xff] %vm985_vm3, %v1267_v42  ;;  %v1067_v62 = vpop.permute.xlu1 %1066  ;;  %v1219_v25 = vcombine.high %v3063_v5, %v3063_v5 }
 0x2b2   : > { %v1063_v55 = vpop.permute.xlu0 %1062  ;;  %1344 = vst.msk [vmem:[#allocation3 + $0x18] sm:$0xff] %vm985_vm3, %v1340_v21  ;;  %v1270_v41 = vmul.f32 %v1232_v59, %v1067_v62  ;;  %v1353_v46 = vmul.f32 %v1349_v49, %v1340_v21  ;;  %v3115_v21 = vrot.slane %v1547_v10, %v2917_v40 }
 0x2b3   : > { %1343 = vst.msk [vmem:[#allocation3 + $0x10] sm:$0xff] %vm985_vm3, %v1339_v44  ;;  %v1269_v27 = vmul.f32 %v1232_v59, %v1063_v55  ;;  %v1356_v35 = vld [vmem:[#allocation3 + $0x28] sm:$0xff]  ;;  %v1352_v5 = vmul.f32 %v1348_v34, %v1339_v44  ;;  %v1236_v19 = vrot.slane %v1219_v25, %v2800_v20 }
 0x2b4   : > { %v1355_v14 = vld [vmem:[#allocation3 + $0x20] sm:$0xff]  ;;  %v1360_v28 = vadd.f32 %v1356_v35, %v1351_v43  ;;  %1302 = vst.msk [vmem:[#allocation3 + $0x48] sm:$0xff] %vm985_vm3, %v1270_v41  ;;  %v1369_v44 = vld [vmem:[#allocation2 + $0x48] sm:$0xff] }
 0x2b5   : > { %v1359_v42 = vadd.f32 %v1355_v14, %v1350_v61  ;;  %1301 = vst.msk [vmem:[#allocation3 + $0x40] sm:$0xff] %vm985_vm3, %v1269_v27  ;;  %v1075_v58 = vpop.permute.xlu1 %1074  ;;  %v1500_v60 = vld [vmem:[#allocation3 + $0x8] sm:$0xff]  ;;  %v3109_v14 = vrot.slane %v1172_v32, %v2917_v40 }
 0x2b6   : > { %v1071_v26 = vpop.permute.xlu0 %1070  ;;  %v1499_v62 = vld [vmem:[#allocation3] sm:$0xff]  ;;  %1364 = vst.msk [vmem:[#allocation3 + $0x28] sm:$0xff] %vm985_vm3, %v1360_v28  ;;  %v1272_v55 = vmul.f32 %v1232_v59, %v1075_v58  ;;  %v1622_v35 = vmul.f32 %v1584_v39, %v1500_v60  ;;  %v1373_v60 = vmul.f32 %v1369_v44, %v1360_v28  ;;  %v1588_v28 = vrot.slane %v3115_v21, %v2800_v20 }
 0x2b7   : > { %1363 = vst.msk [vmem:[#allocation3 + $0x20] sm:$0xff] %vm985_vm3, %v1359_v42  ;;  %v1271_v43 = vmul.f32 %v1232_v59, %v1071_v26  ;;  %v1358_v61 = vld [vmem:[#allocation3 + $0x38] sm:$0xff]  ;;  %v1621_v27 = vmul.f32 %v1584_v39, %v1499_v62  ;;  %v1368_v59 = vld [vmem:[#allocation2 + $0x40] sm:$0xff]  ;;  %v1188_v33 = vcombine.high %v3109_v14, %v3109_v14 }
 0x2b8   : > { %v1357_v41 = vld [vmem:[#allocation3 + $0x30] sm:$0xff]  ;;  %v1362_v57 = vadd.f32 %v1358_v61, %v1353_v46  ;;  %1304 = vst.msk [vmem:[#allocation3 + $0x58] sm:$0xff] %vm985_vm3, %v1272_v55  ;;  %v1656_v58 = vsel %vm985_vm3, %v1622_v35, 0.0  ;;  %v1372_v62 = vmul.f32 %v1368_v59, %v1359_v42  ;;  %v3123_v61 = vrot.slane %v3109_v14, %v2917_v40  ;;  %v1371_v42 = vld [vmem:[#allocation2 + $0x58] sm:$0xff] }
 0x2b9   : > { %v1361_v17 = vadd.f32 %v1357_v41, %v1352_v5  ;;  %1303 = vst.msk [vmem:[#allocation3 + $0x50] sm:$0xff] %vm985_vm3, %v1271_v43  ;;  %v1086_v49 = vpop.permute.xlu1 %1085  ;;  %v1653_v32 = vsel %vm985_vm3, %v1621_v27, 0.0  ;;  %1657 = vadd.xlane.f32.xlu1 %v1656_v58  ;;  %v1502_v10 = vld [vmem:[#allocation3 + $0x18] sm:$0xff]  ;;  %v1370_v27 = vld [vmem:[#allocation2 + $0x50] sm:$0xff] }
 0x2ba   : > { %v1082_v34 = vpop.permute.xlu0 %1081  ;;  %v1501_v26 = vld [vmem:[#allocation3 + $0x10] sm:$0xff]  ;;  %1366 = vst.msk [vmem:[#allocation3 + $0x38] sm:$0xff] %vm985_vm3, %v1362_v57  ;;  %v1274_v46 = vmul.f32 %v1236_v19, %v1086_v49  ;;  %1654 = vadd.xlane.f32.xlu0 %v1653_v32  ;;  %v1375_v32 = vmul.f32 %v1371_v42, %v1362_v57  ;;  %v1390_v57 = vld [vmem:[#allocation2 + $0x60] sm:$0xff] }
 0x2bb   : > { %1365 = vst.msk [vmem:[#allocation3 + $0x30] sm:$0xff] %vm985_vm3, %v1361_v17  ;;  %v1273_v25 = vmul.f32 %v1236_v19, %v1082_v34  ;;  %v1378_v5 = vld [vmem:[#allocation3 + $0x48] sm:$0xff]  ;;  %v1623_v43 = vmul.f32 %v1584_v39, %v1501_v26  ;;  %v1624_v34 = vmul.f32 %v1584_v39, %v1502_v10  ;;  %v1374_v26 = vmul.f32 %v1370_v27, %v1361_v17 }
 0x2bc   : > { %v1377_v55 = vld [vmem:[#allocation3 + $0x40] sm:$0xff]  ;;  %v1382_v41 = vadd.f32 %v1378_v5, %v1373_v60  ;;  %1306 = vst.msk [vmem:[#allocation3 + $0x68] sm:$0xff] %vm985_vm3, %v1274_v46  ;;  %v1240_v39 = vrot.slane %v3123_v61, %v2800_v20  ;;  %v1577_v17 = vcombine.high %v3089_v36, %v3089_v36 }
 0x2bd   : > { %v1381_v35 = vadd.f32 %v1377_v55, %v1372_v62  ;;  %1305 = vst.msk [vmem:[#allocation3 + $0x60] sm:$0xff] %vm985_vm3, %v1273_v25  ;;  %v1094_v44 = vpop.permute.xlu1 %1093  ;;  %v1659_v49 = vsel %vm985_vm3, %v1623_v43, 0.0  ;;  %v1504_v46 = vld [vmem:[#allocation3 + $0x28] sm:$0xff]  ;;  %v1662_v27 = vsel %vm985_vm3, %v1624_v34, 0.0  ;;  %v3145_v34 = vrot.slane %v1188_v33, %v2917_v40 }
 0x2be   : > { %v1090_v59 = vpop.permute.xlu0 %1089  ;;  %v1503_v58 = vld [vmem:[#allocation3 + $0x20] sm:$0xff]  ;;  %1386 = vst.msk [vmem:[#allocation3 + $0x48] sm:$0xff] %vm985_vm3, %v1382_v41  ;;  %v1276_v60 = vmul.f32 %v1236_v19, %v1094_v44  ;;  %1660 = vadd.xlane.f32.xlu0 %v1659_v49  ;;  %v1626_v44 = vmul.f32 %v1588_v28, %v1504_v46 }
 0x2bf   : > { %1385 = vst.msk [vmem:[#allocation3 + $0x40] sm:$0xff] %vm985_vm3, %v1381_v35  ;;  %v1275_v62 = vmul.f32 %v1236_v19, %v1090_v59  ;;  %v1380_v25 = vld [vmem:[#allocation3 + $0x58] sm:$0xff]  ;;  %v1625_v55 = vmul.f32 %v1588_v28, %v1503_v58  ;;  %v1391_v19 = vld [vmem:[#allocation2 + $0x68] sm:$0xff]  ;;  %v1394_v58 = vmul.f32 %v1390_v57, %v1381_v35 }
 0x2c0   : > { %v1379_v5 = vld [vmem:[#allocation3 + $0x50] sm:$0xff]  ;;  %v1384_v31 = vadd.f32 %v1380_v25, %v1375_v32  ;;  %1308 = vst.msk [vmem:[#allocation3 + $0x78] sm:$0xff] %vm985_vm3, %v1276_v60  ;;  %v1395_v49 = vmul.f32 %v1391_v19, %v1382_v41  ;;  %v1592_v41 = vrot.slane %v1577_v17, %v2800_v20  ;;  %v1393_v35 = vld [vmem:[#allocation2 + $0x78] sm:$0xff] }
 0x2c1   : > { %v1383_v43 = vadd.f32 %v1379_v5, %v1374_v26  ;;  %1307 = vst.msk [vmem:[#allocation3 + $0x70] sm:$0xff] %vm985_vm3, %v1275_v62  ;;  %v1105_v10 = vpop.permute.xlu1 %1104  ;;  %v1665_v14 = vsel %vm985_vm3, %v1625_v55, 0.0  ;;  %v1506_v36 = vld [vmem:[#allocation3 + $0x38] sm:$0xff]  ;;  %v1392_v55 = vld [vmem:[#allocation2 + $0x70] sm:$0xff] }
 0x2c2   : > { %v1101_v42 = vpop.permute.xlu0 %1100  ;;  %v1505_v59 = vld [vmem:[#allocation3 + $0x30] sm:$0xff]  ;;  %1388 = vst.msk [vmem:[#allocation3 + $0x58] sm:$0xff] %vm985_vm3, %v1384_v31  ;;  %v1278_v32 = vmul.f32 %v1240_v39, %v1105_v10  ;;  %1666 = vadd.xlane.f32.xlu1 %v1665_v14  ;;  %1663 = vadd.xlane.f32.xlu0 %v1662_v27  ;;  %v1668_v10 = vsel %vm985_vm3, %v1626_v44, 0.0  ;;  %v1628_v27 = vmul.f32 %v1588_v28, %v1506_v36 }
 0x2c3   : > { %1387 = vst.msk [vmem:[#allocation3 + $0x50] sm:$0xff] %vm985_vm3, %v1383_v43  ;;  %v1277_v26 = vmul.f32 %v1240_v39, %v1101_v42  ;;  %v1400_v60 = vld [vmem:[#allocation3 + $0x68] sm:$0xff]  ;;  %v1627_v25 = vmul.f32 %v1588_v28, %v1505_v59  ;;  %v1397_v33 = vmul.f32 %v1393_v35, %v1384_v31  ;;  %v1396_v59 = vmul.f32 %v1392_v55, %v1383_v43 }
 0x2c4   : > { %v1399_v62 = vld [vmem:[#allocation3 + $0x60] sm:$0xff]  ;;  %v1404_v5 = vadd.f32 %v1400_v60, %v1395_v49  ;;  %1310 = vst.msk [vmem:[#allocation3 + $0x88] sm:$0xff] %vm985_vm3, %v1278_v32  ;;  %v1579_v44 = vcombine.high %v3115_v21, %v3115_v21  ;;  %v1244_v31 = vrot.slane %v3145_v34, %v2800_v20  ;;  %v1413_v43 = vld [vmem:[#allocation2 + $0x88] sm:$0xff]  ;;  %v1674_v35 = vsel %vm985_vm3, %v1628_v27, 0.0 }
 0x2c5   : > { %v1403_v46 = vadd.f32 %v1399_v62, %v1394_v58  ;;  %1309 = vst.msk [vmem:[#allocation3 + $0x80] sm:$0xff] %vm985_vm3, %v1277_v26  ;;  %v1113_v19 = vpop.permute.xlu1 %1112  ;;  %v1671_v42 = vsel %vm985_vm3, %v1627_v25, 0.0  ;;  %v1508_v17 = vld [vmem:[#allocation3 + $0x48] sm:$0xff]  ;;  %v1218_v27 = vcombine.high %v3123_v61, %v3123_v61 }
 0x2c6   : > { %v1109_v57 = vpop.permute.xlu0 %1108  ;;  %v1507_v14 = vld [vmem:[#allocation3 + $0x40] sm:$0xff]  ;;  %1408 = vst.msk [vmem:[#allocation3 + $0x68] sm:$0xff] %vm985_vm3, %v1404_v5  ;;  %v1280_v49 = vmul.f32 %v1240_v39, %v1113_v19  ;;  %1672 = vadd.xlane.f32.xlu1 %v1671_v42  ;;  %1669 = vadd.xlane.f32.xlu0 %v1668_v10  ;;  %v1630_v19 = vmul.f32 %v1592_v41, %v1508_v17 }
 0x2c7   : > { %1407 = vst.msk [vmem:[#allocation3 + $0x60] sm:$0xff] %vm985_vm3, %v1403_v46  ;;  %v1279_v58 = vmul.f32 %v1240_v39, %v1109_v57  ;;  %v1402_v32 = vld [vmem:[#allocation3 + $0x78] sm:$0xff]  ;;  %v1629_v60 = vmul.f32 %v1592_v41, %v1507_v14  ;;  %v1412_v39 = vld [vmem:[#allocation2 + $0x80] sm:$0xff]  ;;  %v1417_v21 = vmul.f32 %v1413_v43, %v1404_v5  ;;  %v1596_v5 = vrot.slane %v1579_v44, %v2800_v20 }
 0x2c8   : > { %v1401_v26 = vld [vmem:[#allocation3 + $0x70] sm:$0xff]  ;;  %v1406_v62 = vadd.f32 %v1402_v32, %v1397_v33  ;;  %1312 = vst.msk [vmem:[#allocation3 + $0x98] sm:$0xff] %vm985_vm3, %v1280_v49  ;;  %v1416_v10 = vmul.f32 %v1412_v39, %v1403_v46  ;;  %v2633_v32 = vmov 0   ;;  %v1415_v46 = vld [vmem:[#allocation2 + $0x98] sm:$0xff] }
 0x2c9   : > { %v1405_v28 = vadd.f32 %v1401_v26, %v1396_v59  ;;  %1311 = vst.msk [vmem:[#allocation3 + $0x90] sm:$0xff] %vm985_vm3, %v1279_v58  ;;  %v1124_v36 = vpop.permute.xlu1 %1123  ;;  %v1677_v55 = vsel %vm985_vm3, %v1629_v60, 0.0  ;;  %v1510_v33 = vld [vmem:[#allocation3 + $0x58] sm:$0xff]  ;;  %2488 = vset.pattern.permute.xlu1 %v2633_v32  ;;  %2487 = vset.pattern.permute.xlu0 %v2633_v32  ;;  %v1414_v60 = vld [vmem:[#allocation2 + $0x90] sm:$0xff] }
 0x2ca   : > { %v1120_v25 = vpop.permute.xlu0 %1119  ;;  %v1509_v57 = vld [vmem:[#allocation3 + $0x50] sm:$0xff]  ;;  %1410 = vst.msk [vmem:[#allocation3 + $0x78] sm:$0xff] %vm985_vm3, %v1406_v62  ;;  %v1282_v42 = vmul.f32 %v1244_v31, %v1124_v36  ;;  %1678 = vadd.xlane.f32.xlu1 %v1677_v55  ;;  %1675 = vadd.xlane.f32.xlu0 %v1674_v35  ;;  %v1680_v36 = vsel %vm985_vm3, %v1630_v19, 0.0  ;;  %v1632_v35 = vmul.f32 %v1592_v41, %v1510_v33 }
 0x2cb   : > { %1409 = vst.msk [vmem:[#allocation3 + $0x70] sm:$0xff] %vm985_vm3, %v1405_v28  ;;  %v1281_v14 = vmul.f32 %v1244_v31, %v1120_v25  ;;  %v1422_v59 = vld [vmem:[#allocation3 + $0x88] sm:$0xff]  ;;  %v1631_v58 = vmul.f32 %v1592_v41, %v1509_v57  ;;  %v1419_v61 = vmul.f32 %v1415_v46, %v1406_v62  ;;  %v1418_v57 = vmul.f32 %v1414_v60, %v1405_v28 }
 0x2cc   : > { %v1421_v49 = vld [vmem:[#allocation3 + $0x80] sm:$0xff]  ;;  %v1426_v17 = vadd.f32 %v1422_v59, %v1417_v21  ;;  %1314 = vst.msk [vmem:[#allocation3 + $0xa8] sm:$0xff] %vm985_vm3, %v1282_v42  ;;  %v1248_v41 = vrot.slane %v1218_v27, %v2800_v20  ;;  %v3178_v62 = vrot.slane %v2924_v45, %v2917_v40  ;;  %v1435_v28 = vld [vmem:[#allocation2 + $0xa8] sm:$0xff]  ;;  %v1686_v32 = vsel %vm985_vm3, %v1632_v35, 0.0 }
 0x2cd   : > { %v1425_v26 = vadd.f32 %v1421_v49, %v1416_v10  ;;  %1313 = vst.msk [vmem:[#allocation3 + $0xa0] sm:$0xff] %vm985_vm3, %v1281_v14  ;;  %v1132_v43 = vpop.permute.xlu1 %1131  ;;  %v1683_v25 = vsel %vm985_vm3, %v1631_v58, 0.0  ;;  %v1512_v44 = vld [vmem:[#allocation3 + $0x68] sm:$0xff] }
 0x2ce   : > { %v1128_v39 = vpop.permute.xlu0 %1127  ;;  %v1511_v55 = vld [vmem:[#allocation3 + $0x60] sm:$0xff]  ;;  %1430 = vst.msk [vmem:[#allocation3 + $0x88] sm:$0xff] %vm985_vm3, %v1426_v17  ;;  %v1284_v21 = vmul.f32 %v1244_v31, %v1132_v43  ;;  %1684 = vadd.xlane.f32.xlu1 %v1683_v25  ;;  %1681 = vadd.xlane.f32.xlu0 %v1680_v36  ;;  %v1634_v60 = vmul.f32 %v1596_v5, %v1512_v44 }
 0x2cf   : > { %1429 = vst.msk [vmem:[#allocation3 + $0x80] sm:$0xff] %vm985_vm3, %v1425_v26  ;;  %v1283_v10 = vmul.f32 %v1244_v31, %v1128_v39  ;;  %v1424_v42 = vld [vmem:[#allocation3 + $0x98] sm:$0xff]  ;;  %v1633_v59 = vmul.f32 %v1596_v5, %v1511_v55  ;;  %v1434_v31 = vld [vmem:[#allocation2 + $0xa0] sm:$0xff]  ;;  %v1439_v39 = vmul.f32 %v1435_v28, %v1426_v17  ;;  %v3190_v17 = vrot.slane %v3178_v62, %v2800_v20 }
 0x2d0   : > { %v1423_v14 = vld [vmem:[#allocation3 + $0x90] sm:$0xff]  ;;  %v1428_v49 = vadd.f32 %v1424_v42, %v1419_v61  ;;  %1316 = vst.msk [vmem:[#allocation3 + $0xb8] sm:$0xff] %vm985_vm3, %v1284_v21  ;;  %v1438_v27 = vmul.f32 %v1434_v31, %v1425_v26  ;;  %v1220_v21 = vcombine.high %v3145_v34, %v3145_v34  ;;  %v1437_v26 = vld [vmem:[#allocation2 + $0xb8] sm:$0xff] }
 0x2d1   : > { %v1427_v19 = vadd.f32 %v1423_v14, %v1418_v57  ;;  %1315 = vst.msk [vmem:[#allocation3 + $0xb0] sm:$0xff] %vm985_vm3, %v1283_v10  ;;  %v1143_v33 = vpop.permute.xlu1 %1142  ;;  %v1689_v46 = vsel %vm985_vm3, %v1633_v59, 0.0  ;;  %v1514_v40 = vld [vmem:[#allocation3 + $0x78] sm:$0xff]  ;;  %v1436_v10 = vld [vmem:[#allocation2 + $0xb0] sm:$0xff]  ;;  %v1692_v14 = vsel %vm985_vm3, %v1634_v60, 0.0 }
 0x2d2   : > { %v1139_v58 = vpop.permute.xlu0 %1138  ;;  %v1513_v43 = vld [vmem:[#allocation3 + $0x70] sm:$0xff]  ;;  %1432 = vst.msk [vmem:[#allocation3 + $0x98] sm:$0xff] %vm985_vm3, %v1428_v49  ;;  %v1286_v36 = vmul.f32 %v1248_v41, %v1143_v33  ;;  %1690 = vadd.xlane.f32.xlu1 %v1689_v46  ;;  %1687 = vadd.xlane.f32.xlu0 %v1686_v32  ;;  %v1636_v28 = vmul.f32 %v1596_v5, %v1514_v40 }
 0x2d3   : > { %1431 = vst.msk [vmem:[#allocation3 + $0x90] sm:$0xff] %vm985_vm3, %v1427_v19  ;;  %v1285_v25 = vmul.f32 %v1248_v41, %v1139_v58  ;;  %v1444_v45 = vld [vmem:[#allocation3 + $0xa8] sm:$0xff]  ;;  %v1635_v61 = vmul.f32 %v1596_v5, %v1513_v43  ;;  %v1441_v33 = vmul.f32 %v1437_v26, %v1428_v49  ;;  %v1440_v34 = vmul.f32 %v1436_v10, %v1427_v19  ;;  %v1456_v49 = vld [vmem:[#allocation2 + $0xc0] sm:$0xff] }
 0x2d4   : > { %v1443_v55 = vld [vmem:[#allocation3 + $0xa0] sm:$0xff]  ;;  %v1448_v57 = vadd.f32 %v1444_v45, %v1439_v39  ;;  %1318 = vst.msk [vmem:[#allocation3 + $0xc8] sm:$0xff] %vm985_vm3, %v1286_v36  ;;  %v1252_v5 = vrot.slane %v1220_v21, %v2800_v20 }
 0x2d5   : > { %v1447_v35 = vadd.f32 %v1443_v55, %v1438_v27  ;;  %1317 = vst.msk [vmem:[#allocation3 + $0xc0] sm:$0xff] %vm985_vm3, %v1285_v25  ;;  %v1151_v44 = vpop.permute.xlu1 %1150  ;;  %v1695_v59 = vsel %vm985_vm3, %v1635_v61, 0.0  ;;  %v1516_v46 = vld [vmem:[#allocation3 + $0x88] sm:$0xff] }
 0x2d6   : > { %v1147_v42 = vpop.permute.xlu0 %1146  ;;  %v1515_v31 = vld [vmem:[#allocation3 + $0x80] sm:$0xff]  ;;  %1452 = vst.msk [vmem:[#allocation3 + $0xa8] sm:$0xff] %vm985_vm3, %v1448_v57  ;;  %v1288_v58 = vmul.f32 %v1248_v41, %v1151_v44  ;;  %1696 = vadd.xlane.f32.xlu1 %v1695_v59  ;;  %1693 = vadd.xlane.f32.xlu0 %v1692_v14  ;;  %v1457_v25 = vld [vmem:[#allocation2 + $0xc8] sm:$0xff]  ;;  %v1638_v55 = vmul.f32 %v3190_v17, %v1516_v46 }
 0x2d7   : > { %1451 = vst.msk [vmem:[#allocation3 + $0xa0] sm:$0xff] %vm985_vm3, %v1447_v35  ;;  %v1287_v32 = vmul.f32 %v1248_v41, %v1147_v42  ;;  %v1446_v43 = vld [vmem:[#allocation3 + $0xb8] sm:$0xff]  ;;  %v1637_v27 = vmul.f32 %v3190_v17, %v1515_v31  ;;  %v1698_v41 = vsel %vm985_vm3, %v1636_v28, 0.0  ;;  %v1461_v26 = vmul.f32 %v1457_v25, %v1448_v57 }
 0x2d8   : > { %v1445_v39 = vld [vmem:[#allocation3 + $0xb0] sm:$0xff]  ;;  %v1450_v60 = vadd.f32 %v1446_v43, %v1441_v33  ;;  %1320 = vst.msk [vmem:[#allocation3 + $0xd8] sm:$0xff] %vm985_vm3, %v1288_v58  ;;  %v1460_v10 = vmul.f32 %v1456_v49, %v1447_v35  ;;  %v1604_v57 = vrot.slane %v2933_v50, %v2800_v20  ;;  %v1704_v43 = vsel %vm985_vm3, %v1638_v55, 0.0 }
 0x2d9   : > { %v1449_v36 = vadd.f32 %v1445_v39, %v1440_v34  ;;  %1319 = vst.msk [vmem:[#allocation3 + $0xd0] sm:$0xff] %vm985_vm3, %v1287_v32  ;;  %v1162_v19 = vpop.permute.xlu1 %1161  ;;  %v1701_v45 = vsel %vm985_vm3, %v1637_v27, 0.0  ;;  %v1518_v28 = vld [vmem:[#allocation3 + $0x98] sm:$0xff]  ;;  %v1458_v58 = vld [vmem:[#allocation2 + $0xd0] sm:$0xff]  ;;  %v1578_v55 = vcombine.high %v3178_v62, %v3178_v62 }
 0x2da   : > { %v1158_v40 = vpop.permute.xlu0 %1157  ;;  %v1517_v61 = vld [vmem:[#allocation3 + $0x90] sm:$0xff]  ;;  %1454 = vst.msk [vmem:[#allocation3 + $0xb8] sm:$0xff] %vm985_vm3, %v1450_v60  ;;  %v1290_v44 = vmul.f32 %v1252_v5, %v1162_v19  ;;  %1702 = vadd.xlane.f32.xlu1 %v1701_v45  ;;  %1699 = vadd.xlane.f32.xlu0 %v1698_v41  ;;  %v1459_v34 = vld [vmem:[#allocation2 + $0xd8] sm:$0xff] }
 0x2db   : > { %1453 = vst.msk [vmem:[#allocation3 + $0xb0] sm:$0xff] %vm985_vm3, %v1449_v36  ;;  %v1289_v42 = vmul.f32 %v1252_v5, %v1158_v40  ;;  %v1466_v21 = vld [vmem:[#allocation3 + $0xc8] sm:$0xff]  ;;  %v1639_v59 = vmul.f32 %v3190_v17, %v1517_v61  ;;  %v1463_v35 = vmul.f32 %v1459_v34, %v1450_v60  ;;  %v1462_v25 = vmul.f32 %v1458_v58, %v1449_v36 }
 0x2dc   : > { %v1465_v14 = vld [vmem:[#allocation3 + $0xc0] sm:$0xff]  ;;  %v1470_v31 = vadd.f32 %v1466_v21, %v1461_v26  ;;  %1322 = vst.msk [vmem:[#allocation3 + $0xe8] sm:$0xff] %vm985_vm3, %v1290_v44  ;;  %v1640_v40 = vmul.f32 %v3190_v17, %v1518_v28  ;;  %v1479_v36 = vld [vmem:[#allocation2 + $0xe8] sm:$0xff]  ;;  %v1608_v58 = vrot.slane %v1578_v55, %v2800_v20 }
 0x2dd   : > { %v1469_v33 = vadd.f32 %v1465_v14, %v1460_v10  ;;  %1321 = vst.msk [vmem:[#allocation3 + $0xe0] sm:$0xff] %vm985_vm3, %v1289_v42  ;;  %v1170_v32 = vpop.permute.xlu1 %1169  ;;  %v1707_v39 = vsel %vm985_vm3, %v1639_v59, 0.0  ;;  %v1520_v41 = vld [vmem:[#allocation3 + $0xa8] sm:$0xff]  ;;  %v1478_v44 = vld [vmem:[#allocation2 + $0xe0] sm:$0xff] }
 0x2de   : > { %v1166_v46 = vpop.permute.xlu0 %1165  ;;  %v1519_v27 = vld [vmem:[#allocation3 + $0xa0] sm:$0xff]  ;;  %1474 = vst.msk [vmem:[#allocation3 + $0xc8] sm:$0xff] %vm985_vm3, %v1470_v31  ;;  %v1292_v49 = vmul.f32 %v1252_v5, %v1170_v32  ;;  %1708 = vadd.xlane.f32.xlu1 %v1707_v39  ;;  %1705 = vadd.xlane.f32.xlu0 %v1704_v43  ;;  %v1642_v42 = vmul.f32 %v1604_v57, %v1520_v41  ;;  %v1710_v62 = vsel %vm985_vm3, %v1640_v40, 0.0  ;;  %v1481_v39 = vld [vmem:[#allocation2 + $0xf8] sm:$0xff] }
 0x2df   : > { %1473 = vst.msk [vmem:[#allocation3 + $0xc0] sm:$0xff] %vm985_vm3, %v1469_v33  ;;  %v1291_v19 = vmul.f32 %v1252_v5, %v1166_v46  ;;  %v1468_v60 = vld [vmem:[#allocation3 + $0xd8] sm:$0xff]  ;;  %v1641_v61 = vmul.f32 %v1604_v57, %v1519_v27  ;;  %v1483_v21 = vmul.f32 %v1479_v36, %v1470_v31  ;;  %v1482_v14 = vmul.f32 %v1478_v44, %v1469_v33  ;;  %v1480_v27 = vld [vmem:[#allocation2 + $0xf0] sm:$0xff] }
 0x2e0   : > { %v1467_v45 = vld [vmem:[#allocation3 + $0xd0] sm:$0xff]  ;;  %v1472_v26 = vadd.f32 %v1468_v60, %v1463_v35  ;;  %1324 = vst.msk [vmem:[#allocation3 + $0xf8] sm:$0xff] %vm985_vm3, %v1292_v49 }
 0x2e1   : > { %v1471_v10 = vadd.f32 %v1467_v45, %v1462_v25  ;;  %1323 = vst.msk [vmem:[#allocation3 + $0xf0] sm:$0xff] %vm985_vm3, %v1291_v19  ;;  %v1713_v5 = vsel %vm985_vm3, %v1641_v61, 0.0  ;;  %v1522_v35 = vld [vmem:[#allocation3 + $0xb8] sm:$0xff]  ;;  %v1716_v25 = vsel %vm985_vm3, %v1642_v42, 0.0  ;;  %v1580_v61 = vcombine.high %v2933_v50, %v2933_v50 }
 0x2e2   : > { %v1521_v17 = vld [vmem:[#allocation3 + $0xb0] sm:$0xff]  ;;  %1476 = vst.msk [vmem:[#allocation3 + $0xd8] sm:$0xff] %vm985_vm3, %v1472_v26  ;;  %1714 = vadd.xlane.f32.xlu1 %v1713_v5  ;;  %1711 = vadd.xlane.f32.xlu0 %v1710_v62  ;;  %v1485_v33 = vmul.f32 %v1481_v39, %v1472_v26  ;;  %v1644_v19 = vmul.f32 %v1604_v57, %v1522_v35 }
 0x2e3   : > { %1475 = vst.msk [vmem:[#allocation3 + $0xd0] sm:$0xff] %vm985_vm3, %v1471_v10  ;;  %v1643_v59 = vmul.f32 %v1604_v57, %v1521_v17  ;;  %v1488_v28 = vld [vmem:[#allocation3 + $0xe8] sm:$0xff]  ;;  %v1484_v49 = vmul.f32 %v1480_v27, %v1471_v10  ;;  %v1612_v50 = vrot.slane %v1580_v61, %v2800_v20 }
 0x2e4   : > { %v1487_v34 = vld [vmem:[#allocation3 + $0xe0] sm:$0xff]  ;;  %v1492_v32 = vadd.f32 %v1488_v28, %v1483_v21  ;;  %v1722_v26 = vsel %vm985_vm3, %v1644_v19, 0.0 }
 0x2e5   : > { %v1491_v46 = vadd.f32 %v1487_v34, %v1482_v14  ;;  %v1719_v43 = vsel %vm985_vm3, %v1643_v59, 0.0  ;;  %v1524_v45 = vld [vmem:[#allocation3 + $0xc8] sm:$0xff] }
 0x2e6   : > { %v1523_v31 = vld [vmem:[#allocation3 + $0xc0] sm:$0xff]  ;;  %1496 = vst.msk [vmem:[#allocation3 + $0xe8] sm:$0xff] %vm985_vm3, %v1492_v32  ;;  %1720 = vadd.xlane.f32.xlu1 %v1719_v43  ;;  %1717 = vadd.xlane.f32.xlu0 %v1716_v25  ;;  %v1646_v57 = vmul.f32 %v1608_v58, %v1524_v45 }
 0x2e7   : > { %1495 = vst.msk [vmem:[#allocation3 + $0xe0] sm:$0xff] %vm985_vm3, %v1491_v46  ;;  %v1645_v40 = vmul.f32 %v1608_v58, %v1523_v31  ;;  %v1490_v41 = vld [vmem:[#allocation3 + $0xf8] sm:$0xff] }
 0x2e8   : > { %v1489_v60 = vld [vmem:[#allocation3 + $0xf0] sm:$0xff]  ;;  %v1494_v55 = vadd.f32 %v1490_v41, %v1485_v33  ;;  %v1728_v14 = vsel %vm985_vm3, %v1646_v57, 0.0 }
 0x2e9   : > { %v1493_v36 = vadd.f32 %v1489_v60, %v1484_v49  ;;  %v1725_v44 = vsel %vm985_vm3, %v1645_v40, 0.0  ;;  %v1526_v42 = vld [vmem:[#allocation3 + $0xd8] sm:$0xff] }
 0x2ea   : > { %v1525_v5 = vld [vmem:[#allocation3 + $0xd0] sm:$0xff]  ;;  %1498 = vst.msk [vmem:[#allocation3 + $0xf8] sm:$0xff] %vm985_vm3, %v1494_v55  ;;  %1726 = vadd.xlane.f32.xlu1 %v1725_v44  ;;  %1723 = vadd.xlane.f32.xlu0 %v1722_v26  ;;  %v1648_v62 = vmul.f32 %v1608_v58, %v1526_v42 }
 0x2eb   : > { %1497 = vst.msk [vmem:[#allocation3 + $0xf0] sm:$0xff] %vm985_vm3, %v1493_v36  ;;  %v1647_v10 = vmul.f32 %v1608_v58, %v1525_v5 }
 0x2ec   : > { %v1734_v32 = vsel %vm985_vm3, %v1648_v62, 0.0 }
 0x2ed   : > { %v1731_v17 = vsel %vm985_vm3, %v1647_v10, 0.0  ;;  %v1528_v28 = vld [vmem:[#allocation3 + $0xe8] sm:$0xff] }
 0x2ee   : > { %v1527_v21 = vld [vmem:[#allocation3 + $0xe0] sm:$0xff]  ;;  %1732 = vadd.xlane.f32.xlu1 %v1731_v17  ;;  %1729 = vadd.xlane.f32.xlu0 %v1728_v14  ;;  %v1650_v46 = vmul.f32 %v1612_v50, %v1528_v28 }
 0x2ef   : > { %v1649_v59 = vmul.f32 %v1612_v50, %v1527_v21 }
 0x2f0   : > { %v1740_v27 = vsel %vm985_vm3, %v1650_v46, 0.0 }
 0x2f1   : > { %v1737_v34 = vsel %vm985_vm3, %v1649_v59, 0.0  ;;  %v1530_v39 = vld [vmem:[#allocation3 + $0xf8] sm:$0xff] }
 0x2f2   : > { %v1529_v35 = vld [vmem:[#allocation3 + $0xf0] sm:$0xff]  ;;  %1738 = vadd.xlane.f32.xlu1 %v1737_v34  ;;  %1735 = vadd.xlane.f32.xlu0 %v1734_v32  ;;  %v1652_v25 = vmul.f32 %v1612_v50, %v1530_v39 }
 0x2f3   : > { %v1651_v43 = vmul.f32 %v1612_v50, %v1529_v35 }
 0x2f4   : > { %v1746_v58 = vsel %vm985_vm3, %v1652_v25, 0.0 }
 0x2f5   : > { %v1743_v20 = vsel %vm985_vm3, %v1651_v43, 0.0 }
 0x2f6   : > { %1744 = vadd.xlane.f32.xlu1 %v1743_v20  ;;  %1741 = vadd.xlane.f32.xlu0 %v1740_v27 }
 0x2fa   : > { %1747 = vadd.xlane.f32.xlu0 %v1746_v58 }
 0x346   : > { %v1658_v31 = vpop.xlane.xlu1 %1657 }
 0x347   : > { %v1943_v33 = vadd.f32 %v2870_v3, %v1658_v31  ;;  %v1655_v49 = vpop.xlane.xlu0 %1654 }
 0x348   : > { %v1942_v19 = vadd.f32 %v2864_v63, %v1655_v49 }
 0x349   : > { %2010 = vperm.xlu1 %2488, %v1943_v33  }
 0x34a   : > { %2007 = vperm.xlu0 %2487, %v1942_v19  }
 0x34b   : > { %v1661_v40 = vpop.xlane.xlu0 %1660 }
 0x34c   : > { %v1944_v41 = vadd.f32 %v2867_v1, %v1661_v40  ;;  %v3446_v40 = vld [vmem:[#allocation9_spill] sm:$0xff] }
 0x34e   : > { %2013 = vperm.xlu1 %2488, %v1944_v41  }
 0x34f   : > { %v1667_v60 = vpop.xlane.xlu1 %1666  ;;  %v1664_v45 = vpop.xlane.xlu0 %1663 }
 0x350   : > { %v1946_v61 = vadd.f32 %v2875_v6, %v1667_v60  ;;  %v1945_v55 = vadd.f32 %v2872_v4, %v1664_v45 }
 0x352   : > { %2016 = vperm.xlu0 %2487, %v1945_v55   ;;  %2019 = vperm.xlu1 %2488, %v1946_v61  }
 0x353   : > { %v1673_v36 = vpop.xlane.xlu1 %1672  ;;  %v1670_v44 = vpop.xlane.xlu0 %1669 }
 0x354   : > { %v1948_v3 = vadd.f32 %v2879_v8, %v1673_v36  ;;  %v1947_v63 = vadd.f32 %v2877_v7, %v1670_v44 }
 0x356   : > { %2022 = vperm.xlu0 %2487, %v1947_v63   ;;  %2025 = vperm.xlu1 %2488, %v1948_v3  }
 0x357   : > { %v1679_v5 = vpop.xlane.xlu1 %1678  ;;  %v1676_v26 = vpop.xlane.xlu0 %1675 }
 0x358   : > { %v1950_v1 = vadd.f32 %v2884_v11, %v1679_v5  ;;  %v1949_v57 = vadd.f32 %v2881_v9, %v1676_v26 }
 0x35a   : > { %2028 = vperm.xlu0 %2487, %v1949_v57   ;;  %2031 = vperm.xlu1 %2488, %v1950_v1  }
 0x35b   : > { %v1685_v6 = vpop.xlane.xlu1 %1684  ;;  %v1682_v4 = vpop.xlane.xlu0 %1681 }
 0x35c   : > { %v1952_v10 = vadd.f32 %v2889_v15, %v1685_v6  ;;  %v1951_v42 = vadd.f32 %v2886_v12, %v1682_v4  ;;  %v3447_v6 = vlaneseq }
 0x35e   : > { %2034 = vperm.xlu0 %2487, %v1951_v42   ;;  %2037 = vperm.xlu1 %2488, %v1952_v10   ;;  %v2103_v4 = vand.u32 127, %v3447_v6 }
 0x35f   : > { %v1691_v8 = vpop.xlane.xlu1 %1690  ;;  %v1688_v7 = vpop.xlane.xlu0 %1687 }
 0x360   : > { %v1954_v17 = vadd.f32 %v2894_v22, %v1691_v8  ;;  %v1953_v50 = vadd.f32 %v2891_v16, %v1688_v7  ;;  %v2108_v8 = vadd.s32 4294967288, %v2103_v4  ;;  %v2115_v7 = vadd.s32 4294967280, %v2103_v4 }
 0x362   : > { %2040 = vperm.xlu0 %2487, %v1953_v50   ;;  %2043 = vperm.xlu1 %2488, %v1954_v17  }
 0x363   : > { %v1697_v11 = vpop.xlane.xlu1 %1696  ;;  %v1694_v9 = vpop.xlane.xlu0 %1693 }
 0x364   : > { %v1956_v21 = vadd.f32 %v2901_v29, %v1697_v11  ;;  %v1955_v14 = vadd.f32 %v2896_v23, %v1694_v9  ;;  %v2122_v11 = vadd.s32 4294967272, %v2103_v4  ;;  %v3448_v9 = vld [vmem:[#allocation7_spill] sm:$0xff] }
 0x366   : > { %2046 = vperm.xlu0 %2487, %v1955_v14   ;;  %2049 = vperm.xlu1 %2488, %v1956_v21   ;;  %v3290_v21 = vsub.s32 %v2103_v4, %v3448_v9  ;;  %v3293_v14 = vsub.s32 %v2108_v8, %v3448_v9 }
 0x367   : > { %v1703_v15 = vpop.xlane.xlu1 %1702  ;;  %v1700_v12 = vpop.xlane.xlu0 %1699 }
 0x368   : > { %v1957_v62 = vadd.f32 %v2903_v30, %v1700_v12  ;;  %v1958_v22 = vadd.f32 %v2910_v37, %v1703_v15  ;;  %v3296_v15 = vsub.s32 %v2115_v7, %v3448_v9 }
 0x36a   : > { %2052 = vperm.xlu0 %2487, %v1957_v62  }
 0x36b   : > { %v1709_v59 = vpop.xlane.xlu1 %1708  ;;  %v1706_v28 = vpop.xlane.xlu0 %1705 }
 0x36c   : > { %v1959_v16 = vadd.f32 %v2912_v38, %v1706_v28  ;;  %v1960_v29 = vadd.f32 %v2926_v47, %v1709_v59  ;;  %v3299_v59 = vsub.s32 %v2122_v11, %v3448_v9 }
 0x36e   : > { %2055 = vperm.xlu0 %2487, %v1958_v22   ;;  %2058 = vperm.xlu1 %2488, %v1959_v16  }
 0x36f   : > { %v1715_v34 = vpop.xlane.xlu1 %1714  ;;  %v1712_v35 = vpop.xlane.xlu0 %1711 }
 0x370   : > { %v1961_v23 = vadd.f32 %v2928_v48, %v1712_v35  ;;  %v1962_v30 = vadd.f32 %v2937_v51, %v1715_v34 }
 0x372   : > { %2064 = vperm.xlu0 %2487, %v1961_v23   ;;  %2061 = vperm.xlu1 %2488, %v1960_v29  }
 0x373   : > { %v1721_v32 = vpop.xlane.xlu1 %1720  ;;  %v1718_v46 = vpop.xlane.xlu0 %1717 }
 0x374   : > { %v1963_v43 = vadd.f32 %v2939_v52, %v1718_v46  ;;  %v1964_v39 = vadd.f32 %v2941_v53, %v1721_v32 }
 0x376   : > { %2067 = vperm.xlu0 %2487, %v1962_v30   ;;  %2070 = vperm.xlu1 %2488, %v1963_v43  }
 0x377   : > { %v1727_v37 = vpop.xlane.xlu1 %1726  ;;  %v1724_v38 = vpop.xlane.xlu0 %1723 }
 0x378   : > { %v1965_v20 = vadd.f32 %v2943_v54, %v1724_v38  ;;  %v1966_v27 = vadd.f32 %v2947_v56, %v1727_v37 }
 0x37a   : > { %2076 = vperm.xlu0 %2487, %v1965_v20   ;;  %2073 = vperm.xlu1 %2488, %v1964_v39  }
 0x37b   : > { %v1733_v47 = vpop.xlane.xlu1 %1732  ;;  %v1730_v48 = vpop.xlane.xlu0 %1729 }
 0x37c   : > { %v1967_v25 = vadd.f32 %v2949_v24, %v1730_v48  ;;  %v1968_v58 = vadd.f32 %v2965_v0, %v1733_v47  ;;  %v3445_v24 = vld [vmem:[#allocation8_spill] sm:$0xff] }
 0x37e   : > { %2079 = vperm.xlu0 %2487, %v1966_v27   ;;  %2082 = vperm.xlu1 %2488, %v1967_v25  }
 0x37f   : > { %v1736_v51 = vpop.xlane.xlu0 %1735  ;;  %v1739_v52 = vpop.xlane.xlu1 %1738 }
 0x380   : > { %v1969_v31 = vadd.f32 %v2967_v2, %v1736_v51  ;;  %v1970_v54 = vadd.f32 %v2971_v13, %v1739_v52 }
 0x382   : > { %2088 = vperm.xlu0 %2487, %v1969_v31   ;;  %2085 = vperm.xlu1 %2488, %v1968_v58  }
 0x383   : > { %v1742_v53 = vpop.xlane.xlu0 %1741  ;;  %v1745_v49 = vpop.xlane.xlu1 %1744 }
 0x384   : > { %v1971_v33 = vadd.f32 %v2973_v18, %v1742_v53  ;;  %v1972_v19 = vadd.f32 %v3445_v24, %v1745_v49 }
 0x386   : > { %2094 = vperm.xlu1 %2488, %v1971_v33   ;;  %2091 = vperm.xlu0 %2487, %v1970_v54  }
 0x387   : > { %v1748_v56 = vpop.xlane.xlu0 %1747 }
 0x388   : > { %v1973_v41 = vadd.f32 %v3446_v40, %v1748_v56 }
 0x38a   : > { %2100 = vperm.xlu0 %2487, %v1973_v41   ;;  %2097 = vperm.xlu1 %2488, %v1972_v19  }
 0x3c8   : > { %v2011_v0 = vpop.permute.xlu1 %2010 }
 0x3c9   : > { %v2008_v60 = vpop.permute.xlu0 %2007  ;;  %v2112_v22 = vrot.slane %v2011_v0, %v3293_v14 }
 0x3ca   : > { %v2107_v28 = vrot.slane %v2008_v60, %v3290_v21 }
 0x3cc   : > { %v2114_v32 = vsel %vm2113_vm4, %v2112_v22, %v2107_v28 }
 0x3cd   : > { %v2014_v2 = vpop.permute.xlu1 %2013 }
 0x3ce   : > { %v2119_v16 = vrot.slane %v2014_v2, %v3296_v15 }
 0x3d0   : > { %v2121_v30 = vsel %vm2120_vm5, %v2119_v16, %v2114_v32 }
 0x3d1   : > { %v2017_v45 = vpop.permute.xlu0 %2016  ;;  %v2020_v61 = vpop.permute.xlu1 %2019 }
 0x3d2   : > { %v2126_v29 = vrot.slane %v2017_v45, %v3299_v59  ;;  %v2132_v43 = vrot.slane %v2020_v61, %v3290_v21 }
 0x3d4   : > { %v2128_v39 = vsel %vm2127_vm6, %v2126_v29, %v2121_v30 }
 0x3d5   : > { %v2023_v55 = vpop.permute.xlu0 %2022  ;;  %v3274_v36 = vpop.permute.xlu1 %2025 }
 0x3d6   : > { %v2136_v23 = vrot.slane %v2023_v55, %v3293_v14  ;;  %v2141_v20 = vrot.slane %v3274_v36, %v3296_v15 }
 0x3d8   : > { %v2137_v48 = vsel %vm2113_vm4, %v2136_v23, %v2132_v43 }
 0x3d9   : > { %v3276_v13 = vpop.permute.xlu0 %2028  ;;  %v2032_v18 = vpop.permute.xlu1 %2031  ;;  %v2142_v2 = vsel %vm2120_vm5, %v2141_v20, %v2137_v48 }
 0x3da   : > { %v2151_v47 = vrot.slane %v2032_v18, %v3290_v21  ;;  %v2146_v27 = vrot.slane %v3276_v13, %v3299_v59 }
 0x3dc   : > { %v2147_v36 = vsel %vm2127_vm6, %v2146_v27, %v2142_v2 }
 0x3dd   : > { %v2035_v44 = vpop.permute.xlu0 %2034  ;;  %v3278_v3 = vpop.permute.xlu1 %2037  ;;  %v2263_v11 = vsel %vm2262_vm7, %v2147_v36, %v2128_v39 }
 0x3de   : > { %v2155_v46 = vrot.slane %v2035_v44, %v3293_v14  ;;  %v2160_v25 = vrot.slane %v3278_v3, %v3296_v15 }
 0x3e0   : > { %v2156_v52 = vsel %vm2113_vm4, %v2155_v46, %v2151_v47 }
 0x3e1   : > { %v3280_v63 = vpop.permute.xlu0 %2040  ;;  %v2044_v5 = vpop.permute.xlu1 %2043  ;;  %v2161_v13 = vsel %vm2120_vm5, %v2160_v25, %v2156_v52 }
 0x3e2   : > { %v2165_v58 = vrot.slane %v3280_v63, %v3299_v59  ;;  %v2170_v54 = vrot.slane %v2044_v5, %v3290_v21 }
 0x3e4   : > { %v2166_v3 = vsel %vm2127_vm6, %v2165_v58, %v2161_v13 }
 0x3e5   : > { %v2047_v26 = vpop.permute.xlu0 %2046  ;;  %v3282_v1 = vpop.permute.xlu1 %2049 }
 0x3e6   : > { %v2174_v51 = vrot.slane %v2047_v26, %v3293_v14  ;;  %v2179_v40 = vrot.slane %v3282_v1, %v3296_v15 }
 0x3e8   : > { %v2175_v45 = vsel %vm2113_vm4, %v2174_v51, %v2170_v54 }
 0x3e9   : > { %v3284_v57 = vpop.permute.xlu0 %2052  ;;  %v2180_v6 = vsel %vm2120_vm5, %v2179_v40, %v2175_v45 }
 0x3ea   : > { %v2184_v61 = vrot.slane %v3284_v57, %v3299_v59 }
 0x3ec   : > { %v2185_v8 = vsel %vm2127_vm6, %v2184_v61, %v2180_v6 }
 0x3ed   : > { %v2056_v10 = vpop.permute.xlu0 %2055  ;;  %v2059_v42 = vpop.permute.xlu1 %2058 }
 0x3ee   : > { %v2189_v31 = vrot.slane %v2056_v10, %v3290_v21  ;;  %v2193_v53 = vrot.slane %v2059_v42, %v3293_v14 }
 0x3f0   : > { %v2194_v18 = vsel %vm2113_vm4, %v2193_v53, %v2189_v31 }
 0x3f1   : > { %v3287_v17 = vpop.permute.xlu0 %2064  ;;  %v2062_v50 = vpop.permute.xlu1 %2061 }
 0x3f2   : > { %v2198_v33 = vrot.slane %v2062_v50, %v3296_v15  ;;  %v2203_v44 = vrot.slane %v3287_v17, %v3299_v59 }
 0x3f4   : > { %v2199_v63 = vsel %vm2120_vm5, %v2198_v33, %v2194_v18 }
 0x3f5   : > { %v2068_v12 = vpop.permute.xlu0 %2067  ;;  %v2071_v62 = vpop.permute.xlu1 %2070  ;;  %v2204_v9 = vsel %vm2127_vm6, %v2203_v44, %v2199_v63 }
 0x3f6   : > { %v2208_v49 = vrot.slane %v2068_v12, %v3290_v21  ;;  %v2212_v56 = vrot.slane %v2071_v62, %v3293_v14  ;;  %v2265_v12 = vsel %vm2264_vm8, %v2166_v3, %v2263_v11 }
 0x3f7   : > { %v2267_v16 = vsel %vm2266_vm9, %v2185_v8, %v2265_v12 }
 0x3f8   : > { %v2213_v5 = vsel %vm2113_vm4, %v2212_v56, %v2208_v49 }
 0x3f9   : > { %v3304_v34 = vpop.permute.xlu0 %2076  ;;  %v2074_v35 = vpop.permute.xlu1 %2073 }
 0x3fa   : > { %v2217_v41 = vrot.slane %v2074_v35, %v3296_v15  ;;  %v2222_v26 = vrot.slane %v3304_v34, %v3299_v59  ;;  %v2269_v35 = vsel %vm2268_vm10, %v2204_v9, %v2267_v16 }
 0x3fc   : > { %v2218_v4 = vsel %vm2120_vm5, %v2217_v41, %v2213_v5 }
 0x3fd   : > { %v2080_v37 = vpop.permute.xlu0 %2079  ;;  %v2083_v38 = vpop.permute.xlu1 %2082  ;;  %v2223_v62 = vsel %vm2127_vm6, %v2222_v26, %v2218_v4 }
 0x3fe   : > { %v2227_v0 = vrot.slane %v2080_v37, %v3290_v21  ;;  %v2231_v60 = vrot.slane %v2083_v38, %v3293_v14  ;;  %v2271_v23 = vsel %vm2270_vm11, %v2223_v62, %v2269_v35 }
 0x400   : > { %v2232_v10 = vsel %vm2113_vm4, %v2231_v60, %v2227_v0 }
 0x401   : > { %v2089_v24 = vpop.permute.xlu0 %2088  ;;  %v2086_v19 = vpop.permute.xlu1 %2085 }
 0x402   : > { %v2236_v55 = vrot.slane %v2086_v19, %v3296_v15  ;;  %v2241_v42 = vrot.slane %v2089_v24, %v3299_v59 }
 0x404   : > { %v2237_v7 = vsel %vm2120_vm5, %v2236_v55, %v2232_v10 }
 0x405   : > { %v2092_v1 = vpop.permute.xlu0 %2091  ;;  %v2095_v57 = vpop.permute.xlu1 %2094 }
 0x406   : > { %v2246_v17 = vrot.slane %v2092_v1, %v3290_v21  ;;  %v2250_v50 = vrot.slane %v2095_v57, %v3293_v14  ;;  %v2242_v21 = vsel %vm2127_vm6, %v2241_v42, %v2237_v7 }
 0x407   : > { %v2273_v30 = vsel %vm2272_vm12, %v2242_v21, %v2271_v23 }
 0x408   : > { %v2251_v29 = vsel %vm2113_vm4, %v2250_v50, %v2246_v17 }
 0x409   : > { %v2101_v28 = vpop.permute.xlu0 %2100  ;;  %v2098_v22 = vpop.permute.xlu1 %2097 }
 0x40a   : > { %v2260_v34 = vrot.slane %v2101_v28, %v3299_v59  ;;  %v2255_v14 = vrot.slane %v2098_v22, %v3296_v15 }
 0x40c   : > { %v2256_v32 = vsel %vm2120_vm5, %v2255_v14, %v2251_v29 }
 0x40d   : > { %v2261_v46 = vsel %vm2127_vm6, %v2260_v34, %v2256_v32 }
 0x40e   : > { %v2275_v15 = vsel %vm2274_vm13, %v2261_v46, %v2273_v30 }
 0x40f   : > { %2277 = vst.msk [vmem:[%s377_s12] sm:$0xff] %vm394_vm1, %v2275_v15 }
 0x410   : > { %2578 = shalt.err (!%p2575_p3)
}
 0x411   : > { %s2579_s25 = scalar_lea.hbm %s3380_s16, 128  ;;  %s2583_s15 = scalar_lea.hbm %s3436_s11, 256 }
 0x412   : > { %p2580_p4 = scmp.ne.s32.totalorder %s3380_s16, %s2579_s25  ;;  %p2584_p9 = scmp.lt.u32.totalorder %s3380_s16, %s3436_s11 }
 0x413   : > { %p2585_p10 = scmp.lt.u32.totalorder %s2583_s15, %s2579_s25  ;;  %p2587_p12 = scmp.lt.u32.totalorder %s2579_s25, %s3380_s16 }
 0x414   : > { %p2581_p7 = pnand %p2580_p4, %p2733_p5 }
 0x415   : > { %p2586_p11 = por %p2585_p10, %p2584_p9 }
 0x416   : > { %p2582_p8 = pneg %p2581_p7 }
 0x417   : > { %p2588_p13 = por %p2587_p12, %p2586_p11 }
 0x419   : > { %p2589_p0 = pnand %p2588_p13, %p2582_p8 }
 0x41b   : > { %2592 = shalt.err (!%p2589_p0)
}
 0x41c   : > { %2443 = dma.vmem_to_hbm [thread:$0]  (%p2733_p5), %s3382_s13, 128, %s3380_s16, %s2279_s21  }
 0x41d PF: > { %p2449_p1 = scmp.ge.s32.totalorder %s2627_s20, 2  ;;  %s2304_s22 = sand.u32 1, %s2615_s17  }
 0x41e   : > { %s2305_s30 = scalar_lea.sflag [#allocation5], %s2304_s22 }
 0x41f   : > { %p2446_p2 = pnand %p2449_p1, %p2737_p6 }
 0x421   : > { %2610 = dma.done.wait (!%p2446_p2), %s2305_s30, 128  }
 0x422   : > { %2612 = vsyncadd (!%p2446_p2), %s2305_s30, 4294967168  ;;  %p21_p3 = scmp.ge.s32.totalorder %s2720_s23, 4   ;;  %s3449_s17 = smov %s2619_s18 }
 0x423   : > { %s3450_s18 = smov %s2623_s19  ;;  %s3451_s19 = smov %s2731_s26 }
 0x424   : > { %s3452_s20 = smov %s2720_s23  ;;  %23 = sbr.rel (!%p21_p3) target bundleno = 3 (0x3), region = 113 }
 0x42b   :  { %2310 = vsyncpa [#allocation5], 1 }
 0x42c   :  { %2312 = vsyncpa [#allocation5 + $0x1], 1 }

</bundles_post_ra>
